<compile_context>
chip_gen: v7x
topology: tpu7x:2x2x1
jax: 0.10.0
libtpu: 0.0.40
codegen_flags: <defaults>
</compile_context>

<pallas_src>
import jax
import jax.numpy as jnp
from jax.experimental import pallas as pl
from jax.experimental.pallas import tpu as pltpu

LN_EPS = 1e-5  # PyTorch nn.LayerNorm default eps

D1, D2, DH, DF, DT, DB = 64, 128, 64, 256, 64, 128  # hidden sizes (fixed by the module)


def _relu(x):
    return jnp.maximum(x, 0.0)


def _layer_norm(x, gamma, beta):
    mu = jnp.mean(x, axis=-1, keepdims=True)
    var = jnp.mean(jnp.square(x - mu), axis=-1, keepdims=True)
    return (x - mu) * jax.lax.rsqrt(var + LN_EPS) * gamma + beta


def _ru16(n):
    return (n + 15) // 16 * 16


def pack_params(p, polyline_features):
    """Pack all parameters into a bf16 weight slab and an f32 bias/LN slab."""
    fin = polyline_features

    # ---- weight slab layout (row offsets, 16-aligned for bf16 sublane packing) ----
    offs, r = {}, 0
    for name, rows in (("ws1", fin), ("ws2", D1), ("wqkv", D2), ("wo", DH),
                       ("w1", D2), ("w2f", DF), ("wbr", DT), ("wout", 2 * DB)):
        offs[name] = r
        r += _ru16(rows)
    rw = r

    w = jnp.zeros((rw, 256), jnp.float32)

    def put(name, col, arr):
        nonlocal w
        r0 = offs[name]
        w = w.at[r0:r0 + arr.shape[0], col:col + arr.shape[1]].set(arr)

    put("ws1", 0, p["ws1"])                                        # [Fin,64]
    put("ws2", 0, p["ws2a"])                                       # [64,128]
    put("ws2", 128, p["ws2b"])                                     # [64,128]
    put("wqkv", 0, jnp.concatenate([p["wk"], p["wv"]], axis=1))    # K|V  [128,128]
    put("wqkv", 2 * DH, p["wq"])                                   # Q    [128,64] (agent row only)
    put("wo", 0, p["wo"])                                          # [64,128]
    put("w1", 0, p["w1"])                                          # [128,256]
    put("w2f", 0, p["w2f"])                                        # [256,64]
    put("wbr", 0, jnp.concatenate([p["wc1"], p["wf1"]], axis=1))   # [64,256]
    wout = jnp.zeros((2 * DB, 128), jnp.float32)                   # lane-dense (padded to 128)
    wout = wout.at[0:DB, 0:2].set(p["wc2"])                        # block-diag
    wout = wout.at[DB:2 * DB, 2:3].set(p["wf2"])
    put("wout", 0, wout)                                           # [256,128]
    w_slab = w.astype(jnp.bfloat16)

    # ---- bias / LayerNorm / small-weight slab (f32), one row per parameter ----
    nb = 24
    b = jnp.zeros((nb, 256), jnp.float32)

    def putb(row, arr):
        nonlocal b
        b = b.at[row:row + arr.shape[0], 0:arr.shape[1]].set(arr)

    putb(0, p["bs1"]); putb(1, p["gs1"]); putb(2, p["bs1n"])
    putb(3, p["bs2"]); putb(4, p["gs2"]); putb(5, p["bs2n"])
    putb(6, p["b1"]); putb(7, p["g1n"]); putb(8, p["b1n"])
    putb(9, p["b2"]); putb(10, p["g2n"]); putb(11, p["b2n"])
    putb(12, jnp.concatenate([p["bc1"], p["bf1"]], axis=1))
    putb(13, jnp.concatenate([p["gc1"], p["gf1"]], axis=1))
    putb(14, jnp.concatenate([p["bc1n"], p["bf1n"]], axis=1))
    putb(15, jnp.concatenate([p["bc2"], p["bf2"]], axis=1))        # cols 0:3, rest zero
    putb(16, p["w2a"])                                             # rows 16:18, cols 0:64

    return w_slab, b, offs


def target_generator(inputs, anchors, params):
    B, P, C, Fin = inputs.shape
    _, N, _ = anchors.shape
    w_slab, b_slab, O = pack_params(params, Fin)
    RW, NB = w_slab.shape[0], b_slab.shape[0]

    # ---- batch-block sizing: fill the MXU (M ~ 512 rows) within a ~10 MiB VMEM budget ----
    rows = P * C
    tb = max(1, -(-512 // rows))                                   # ceil(512 / rows)
    per_sample = (rows * (Fin * 2 + (D1 + D2) * 4)                 # x block + h1 + h2 (f32)
                  + P * 3 * DH * 4                                 # kv / poly
                  + N * (DT + 2 * DB + 128 + 2) * 4                # t / hb / out3 / anchors
                  + (DF + DT) * 4 + 4096)
    tb = min(tb, max(8, (10 << 20) // per_sample))
    if tb >= B:
        TB, B_pad = B, B                                           # single grid step, full-extent blocks
    else:
        TB = ((tb + 7) // 8) * 8                                   # keep blocked sublane dims 8-aligned
        if TB >= B:
            TB, B_pad = B, B
        else:
            B_pad = -(-B // TB) * TB                               # host-side zero padding of ragged batch
    G = B_pad // TB

    if B_pad != B:
        pad = B_pad - B
        inputs = jnp.pad(inputs, ((0, pad), (0, 0), (0, 0), (0, 0)))
        anchors = jnp.pad(anchors, ((0, pad), (0, 0), (0, 0)))

    x_flat = inputs.reshape(B_pad * rows, Fin).astype(jnp.bfloat16)           # bf16 DMA
    anc_flat = jnp.transpose(anchors, (0, 2, 1)).reshape(B_pad, 2 * N)        # [x..x, y..y] per row
    inv_sqrt_dh = 1.0 / float(DH) ** 0.5

    def kernel(x_ref, anc_ref, w_ref, b_ref, feat_ref, out3_ref):
        def wsl(name, nrows, c0, cols):  # static weight-slab slice (bf16)
            r0 = O[name]
            return w_ref[r0:r0 + nrows, c0:c0 + cols]

        bias = b_ref[...]                                   # [24,256] f32, 6 vregs

        def brow(r, c0, d):
            return bias[r:r + 1, c0:c0 + d]

        x = x_ref[...]                                      # [TB*P*C, Fin] bf16
        anc = anc_ref[...]                                  # [TB, 2N] f32
        ax = anc[:, 0:N]                                    # [TB, N] anchor x
        ay = anc[:, N:2 * N]                                # [TB, N] anchor y

        # ---------------- VectorNet: polyline subgraph ----------------
        # TODO(synk): VectorNet submodule source not provided; canonical PointNet-style
        # subgraph + single-head global self-attention producing a 128-d agent feature.
        h1 = jnp.dot(x, wsl("ws1", Fin, 0, D1),
                     preferred_element_type=jnp.float32) + brow(0, 0, D1)
        h1 = _relu(_layer_norm(h1, brow(1, 0, D1), brow(2, 0, D1)))      # [TB*P*C, 64]
        g1 = jnp.max(h1.reshape(TB * P, C, D1), axis=1)                  # [TB*P, 64] per-polyline max
        # concat([node, pooled]) @ W == node @ W[:64] + pooled @ W[64:]
        h2 = (jnp.dot(h1.astype(jnp.bfloat16), wsl("ws2", D1, 0, D2),
                      preferred_element_type=jnp.float32).reshape(TB * P, C, D2)
              + jnp.dot(g1.astype(jnp.bfloat16), wsl("ws2", D1, D2, D2),
                        preferred_element_type=jnp.float32)[:, None, :]
              + brow(3, 0, D2))
        h2 = _relu(_layer_norm(h2, brow(4, 0, D2), brow(5, 0, D2)))      # [TB*P, C, 128]
        poly = jnp.max(h2, axis=1)                                       # [TB*P, 128]

        # -------- global interaction graph: fused K|V for all rows, Q agent-only --------
        poly_b = poly.astype(jnp.bfloat16)
        kv = jnp.dot(poly_b, wsl("wqkv", D2, 0, 2 * DH),
                     preferred_element_type=jnp.float32).reshape(TB, P, 2 * DH)
        agent = poly.reshape(TB, P, D2)[:, 0:1, :].reshape(TB, D2).astype(jnp.bfloat16)
        q_a = jnp.dot(agent, wsl("wqkv", D2, 2 * DH, DH),
                      preferred_element_type=jnp.float32)                # [TB, 64] agent query
        k3 = kv[:, :, 0:DH]                                              # [TB, P, 64]
        v3 = kv[:, :, DH:2 * DH]                                         # [TB, P, 64]
        s = jnp.sum(q_a[:, None, :] * k3, axis=-1) * inv_sqrt_dh         # [TB, P]
        s = s - jnp.max(s, axis=-1, keepdims=True)
        pr = jnp.exp(s)
        pr = pr / jnp.sum(pr, axis=-1, keepdims=True)                    # exact softmax divide
        ctx = jnp.sum(pr[:, :, None] * v3, axis=1)                       # [TB, 64]
        vn_feat = jnp.dot(ctx.astype(jnp.bfloat16), wsl("wo", DH, 0, D2),
                          preferred_element_type=jnp.float32)            # [TB, 128]

        # ---------------- TargetGenerator head ----------------
        f = jnp.dot(vn_feat.astype(jnp.bfloat16), wsl("w1", D2, 0, DF),
                    preferred_element_type=jnp.float32) + brow(6, 0, DF)
        f = _relu(_layer_norm(f, brow(7, 0, DF), brow(8, 0, DF)))        # [TB, 256]
        feat_ref[...] = f

        # linear2 over concat([expanded_features, anchors]) via split weights (exact).
        hf = jnp.dot(f.astype(jnp.bfloat16), wsl("w2f", DF, 0, DT),
                     preferred_element_type=jnp.float32) + brow(9, 0, DT)     # [TB, 64]
        ha = ax[:, :, None] * brow(16, 0, DT) + ay[:, :, None] * brow(17, 0, DT)  # [TB, N, 64]
        t = _relu(_layer_norm(hf[:, None, :] + ha, brow(10, 0, DT), brow(11, 0, DT)))
        t2 = t.reshape(TB * N, DT).astype(jnp.bfloat16)                  # [TB*N, 64]

        # Fused corrections|confidence branch: one matmul, two half LayerNorms,
        # one block-diagonal lane-dense [256,128] matmul, one unmasked store.
        hb = jnp.dot(t2, wsl("wbr", DT, 0, 2 * DB),
                     preferred_element_type=jnp.float32) + brow(12, 0, 2 * DB)   # [TB*N, 256]
        c = _relu(_layer_norm(hb[:, 0:DB], brow(13, 0, DB), brow(14, 0, DB)))
        cf = _relu(_layer_norm(hb[:, DB:2 * DB], brow(13, DB, DB), brow(14, DB, DB)))
        comb = jnp.concatenate([c, cf], axis=-1).astype(jnp.bfloat16)    # [TB*N, 256]
        out3 = jnp.dot(comb, wsl("wout", 2 * DB, 0, 128),
                       preferred_element_type=jnp.float32) + brow(15, 0, 128)    # [TB*N, 128]
        out3_ref[...] = out3                                             # lane-dense store

    grid_spec = pltpu.PrefetchScalarGridSpec(
        num_scalar_prefetch=0,
        grid=(G,),
        in_specs=[
            pl.BlockSpec((TB * rows, Fin), lambda b: (b, 0)),
            pl.BlockSpec((TB, 2 * N), lambda b: (b, 0)),
            pl.BlockSpec((RW, 256), lambda b: (0, 0)),   # grid-invariant weight slab
            pl.BlockSpec((NB, 256), lambda b: (0, 0)),   # grid-invariant bias/LN slab
        ],
        out_specs=[
            pl.BlockSpec((TB, DF), lambda b: (b, 0)),
            pl.BlockSpec((TB * N, 128), lambda b: (b, 0)),
        ],
    )
    out_shape = (
        jax.ShapeDtypeStruct((B_pad, DF), jnp.float32),
        jax.ShapeDtypeStruct((B_pad * N, 128), jnp.float32),
    )

    # Advisory cost estimate so XLA schedules the wrapper-side pack/cast/slice sensibly.
    flops = 2 * B_pad * (rows * Fin * D1 + rows * D1 * D2 + P * D1 * D2
                         + P * D2 * 2 * DH + D2 * DH + DH * D2
                         + D2 * DF + DF * DT + N * DT * 2 * DB + N * 2 * DB * 128)
    transcendentals = B_pad * (P + 2 * rows + 3 * N + 2)
    bytes_accessed = (x_flat.size * 2 + anc_flat.size * 4
                      + w_slab.size * 2 + b_slab.size * 4
                      + B_pad * DF * 4 + B_pad * N * 128 * 4)

    features, out3 = pl.pallas_call(
        kernel,
        out_shape=out_shape,
        grid_spec=grid_spec,
        compiler_params=pltpu.CompilerParams(
            dimension_semantics=("parallel",),
            vmem_limit_bytes=32 * 1024 * 1024,
        ),
        cost_estimate=pl.CostEstimate(flops=flops,
                                      transcendentals=transcendentals,
                                      bytes_accessed=bytes_accessed),
    )(x_flat, anc_flat, w_slab, b_slab)

    out3 = out3.reshape(B_pad, N, 128)
    return features[:B], out3[:B, :, 0:2], out3[:B, :, 2]


def init_params(key, polyline_features):
    """Deterministic synthetic parameters (shapes match the torch module's __init__)."""
    ks = iter(jax.random.split(key, 16))

    def lin_w(fan_in, fan_out):
        return (jax.random.normal(next(ks), (fan_in, fan_out), jnp.float32)
                * (1.0 / jnp.sqrt(fan_in)))

    def zeros(d):
        return jnp.zeros((1, d), jnp.float32)

    def ones(d):
        return jnp.ones((1, d), jnp.float32)

    return {
        # --- VectorNet subgraph ---
        "ws1": lin_w(polyline_features, D1), "bs1": zeros(D1), "gs1": ones(D1), "bs1n": zeros(D1),
        "ws2a": lin_w(D1, D2), "ws2b": lin_w(D1, D2),
        "bs2": zeros(D2), "gs2": ones(D2), "bs2n": zeros(D2),
        # --- VectorNet global attention ---
        "wq": lin_w(D2, DH), "wk": lin_w(D2, DH), "wv": lin_w(D2, DH), "wo": lin_w(DH, D2),
        # --- head: linear1 (128->256) + LN ---
        "w1": lin_w(D2, DF), "b1": zeros(DF), "g1n": ones(DF), "b1n": zeros(DF),
        # --- head: linear2 (258->64) split into [256->64, 2->64] + LN ---
        "w2f": lin_w(DF, DT), "w2a": lin_w(2, DT),
        "b2": zeros(DT), "g2n": ones(DT), "b2n": zeros(DT),
        # --- corrections branch: 64->128 (+LN), 128->2 ---
        "wc1": lin_w(DT, DB), "bc1": zeros(DB), "gc1": ones(DB), "bc1n": zeros(DB),
        "wc2": lin_w(DB, 2), "bc2": zeros(2),
        # --- confidence branch: 64->128 (+LN), 128->1 ---
        "wf1": lin_w(DT, DB), "bf1": zeros(DB), "gf1": ones(DB), "bf1n": zeros(DB),
        "wf2": lin_w(DB, 1), "bf2": zeros(1),
    }


if __name__ == "__main__":
    cluster_size = 8        # points per polyline
    polyline_features = 16  # features per polyline point
    B, P, N = 2, 8, 8       # batch, polylines, anchors

    key = jax.random.PRNGKey(0)
    k_in, k_anc, k_par = jax.random.split(key, 3)
    inputs = jax.random.normal(k_in, (B, P, cluster_size, polyline_features), jnp.float32)
    anchors = jax.random.normal(k_anc, (B, N, 2), jnp.float32)
    params = init_params(k_par, polyline_features)

    features, offsets, confidences = target_generator(inputs, anchors, params)
    jax.block_until_ready((features, offsets, confidences))

    assert features.shape == (B, 256)
    assert offsets.shape == (B, N, 2)
    assert confidences.shape == (B, N)
    print("KERNEL_OK")
</pallas_src>

<mosaic_0001>
module attributes {stable_mosaic.version = 11 : i64} {
  func.func @kernel(%arg0: i32, %arg1: memref<128x16xbf16, #tpu.memory_space<vmem>>, %arg2: memref<2x16xf32, #tpu.memory_space<vmem>>, %arg3: memref<976x256xbf16, #tpu.memory_space<vmem>>, %arg4: memref<24x256xf32, #tpu.memory_space<vmem>>, %arg5: memref<2x256xf32, #tpu.memory_space<vmem>>, %arg6: memref<16x128xf32, #tpu.memory_space<vmem>>) attributes {dimension_semantics = [#tpu.dimension_semantics<parallel>], iteration_bounds = array<i64: 1>, scalar_prefetch = 0 : i64, scratch_operands = 0 : i64, tpu.core_type = #tpu.core_type<tc>, window_params = [{transform_indices = @transform_0, window_bounds = array<i64: 128, 16>}, {transform_indices = @transform_1, window_bounds = array<i64: 2, 16>}, {pipeline_mode = #tpu.pipeline_mode<synchronous>, transform_indices = @transform_2, window_bounds = array<i64: 976, 256>}, {pipeline_mode = #tpu.pipeline_mode<synchronous>, transform_indices = @transform_3, window_bounds = array<i64: 24, 256>}, {transform_indices = @transform_4, window_bounds = array<i64: 2, 256>}, {transform_indices = @transform_5, window_bounds = array<i64: 16, 128>}]} {
    %c0 = arith.constant 0 : index
    %c0_0 = arith.constant 0 : index
    %0 = vector.load %arg4[%c0, %c0_0] : memref<24x256xf32, #tpu.memory_space<vmem>>, vector<24x256xf32>
    %c0_1 = arith.constant 0 : index
    %c0_2 = arith.constant 0 : index
    %1 = vector.load %arg1[%c0_1, %c0_2] : memref<128x16xbf16, #tpu.memory_space<vmem>>, vector<128x16xbf16>
    %c0_3 = arith.constant 0 : index
    %c0_4 = arith.constant 0 : index
    %2 = vector.load %arg2[%c0_3, %c0_4] : memref<2x16xf32, #tpu.memory_space<vmem>>, vector<2x16xf32>
    %3 = vector.extract_strided_slice %2 {offsets = [0, 0], sizes = [2, 8], strides = [1, 1]} : vector<2x16xf32> to vector<2x8xf32>
    %4 = vector.extract_strided_slice %2 {offsets = [0, 8], sizes = [2, 8], strides = [1, 1]} : vector<2x16xf32> to vector<2x8xf32>
    %c0_5 = arith.constant 0 : index
    %c0_6 = arith.constant 0 : index
    %5 = vector.load %arg3[%c0_5, %c0_6] : memref<976x256xbf16, #tpu.memory_space<vmem>>, vector<16x64xbf16>
    %cst = arith.constant dense<0.000000e+00> : vector<128x64xf32>
    %6 = tpu.matmul %1, %5, %cst {dimension_numbers = #tpu.dot_dimension_numbers<[1], [0], [0], [1], [0, 0, 1, 1], [], []>} : vector<128x16xbf16>, vector<16x64xbf16>, vector<128x64xf32> -> vector<128x64xf32>
    %7 = vector.extract_strided_slice %0 {offsets = [0, 0], sizes = [1, 64], strides = [1, 1]} : vector<24x256xf32> to vector<1x64xf32>
    %8 = vector.broadcast %7 : vector<1x64xf32> to vector<128x64xf32>
    %9 = arith.addf %6, %8 : vector<128x64xf32>
    %10 = vector.extract_strided_slice %0 {offsets = [1, 0], sizes = [1, 64], strides = [1, 1]} : vector<24x256xf32> to vector<1x64xf32>
    %11 = vector.extract_strided_slice %0 {offsets = [2, 0], sizes = [1, 64], strides = [1, 1]} : vector<24x256xf32> to vector<1x64xf32>
    %cst_7 = arith.constant dense<0.000000e+00> : vector<128xf32>
    %12 = vector.multi_reduction <add>, %9, %cst_7 [1] : vector<128x64xf32> to vector<128xf32>
    %13 = vector.shape_cast %12 : vector<128xf32> to vector<128x1xf32>
    %cst_8 = arith.constant 6.400000e+01 : f32
    %14 = vector.broadcast %cst_8 : f32 to vector<128x1xf32>
    %15 = arith.divf %13, %14 : vector<128x1xf32>
    %16 = vector.broadcast %15 : vector<128x1xf32> to vector<128x64xf32>
    %17 = arith.subf %9, %16 : vector<128x64xf32>
    %18 = arith.mulf %17, %17 : vector<128x64xf32>
    %cst_9 = arith.constant dense<0.000000e+00> : vector<128xf32>
    %19 = vector.multi_reduction <add>, %18, %cst_9 [1] : vector<128x64xf32> to vector<128xf32>
    %20 = vector.shape_cast %19 : vector<128xf32> to vector<128x1xf32>
    %cst_10 = arith.constant 6.400000e+01 : f32
    %21 = vector.broadcast %cst_10 : f32 to vector<128x1xf32>
    %22 = arith.divf %20, %21 : vector<128x1xf32>
    %23 = vector.broadcast %15 : vector<128x1xf32> to vector<128x64xf32>
    %24 = arith.subf %9, %23 : vector<128x64xf32>
    %cst_11 = arith.constant 9.99999974E-6 : f32
    %25 = vector.broadcast %cst_11 : f32 to vector<128x1xf32>
    %26 = arith.addf %22, %25 : vector<128x1xf32>
    %27 = math.rsqrt %26 : vector<128x1xf32>
    %28 = vector.broadcast %27 : vector<128x1xf32> to vector<128x64xf32>
    %29 = arith.mulf %24, %28 : vector<128x64xf32>
    %30 = vector.broadcast %10 : vector<1x64xf32> to vector<128x64xf32>
    %31 = arith.mulf %29, %30 : vector<128x64xf32>
    %32 = vector.broadcast %11 : vector<1x64xf32> to vector<128x64xf32>
    %33 = arith.addf %31, %32 : vector<128x64xf32>
    %cst_12 = arith.constant 0.000000e+00 : f32
    %34 = vector.broadcast %cst_12 : f32 to vector<128x64xf32>
    %35 = arith.maximumf %33, %34 : vector<128x64xf32>
    %36 = vector.shape_cast %35 : vector<128x64xf32> to vector<16x8x64xf32>
    %cst_13 = arith.constant dense<0xFF800000> : vector<16x64xf32>
    %37 = vector.multi_reduction <maximumf>, %36, %cst_13 [1] : vector<16x8x64xf32> to vector<16x64xf32>
    %38 = arith.truncf %35 : vector<128x64xf32> to vector<128x64xbf16>
    %c16 = arith.constant 16 : index
    %c0_14 = arith.constant 0 : index
    %39 = vector.load %arg3[%c16, %c0_14] : memref<976x256xbf16, #tpu.memory_space<vmem>>, vector<64x128xbf16>
    %cst_15 = arith.constant dense<0.000000e+00> : vector<128x128xf32>
    %40 = tpu.matmul %38, %39, %cst_15 {dimension_numbers = #tpu.dot_dimension_numbers<[1], [0], [0], [1], [0, 0, 1, 1], [], []>} : vector<128x64xbf16>, vector<64x128xbf16>, vector<128x128xf32> -> vector<128x128xf32>
    %41 = vector.shape_cast %40 : vector<128x128xf32> to vector<16x8x128xf32>
    %42 = arith.truncf %37 : vector<16x64xf32> to vector<16x64xbf16>
    %c16_16 = arith.constant 16 : index
    %c128 = arith.constant 128 : index
    %43 = vector.load %arg3[%c16_16, %c128] : memref<976x256xbf16, #tpu.memory_space<vmem>>, vector<64x128xbf16>
    %cst_17 = arith.constant dense<0.000000e+00> : vector<16x128xf32>
    %44 = tpu.matmul %42, %43, %cst_17 {dimension_numbers = #tpu.dot_dimension_numbers<[1], [0], [0], [1], [0, 0, 1, 1], [], []>} : vector<16x64xbf16>, vector<64x128xbf16>, vector<16x128xf32> -> vector<16x128xf32>
    %45 = vector.shape_cast %44 : vector<16x128xf32> to vector<16x1x128xf32>
    %46 = vector.broadcast %45 : vector<16x1x128xf32> to vector<16x8x128xf32>
    %47 = arith.addf %41, %46 : vector<16x8x128xf32>
    %48 = vector.extract_strided_slice %0 {offsets = [3, 0], sizes = [1, 128], strides = [1, 1]} : vector<24x256xf32> to vector<1x128xf32>
    %49 = vector.shape_cast %48 : vector<1x128xf32> to vector<1x1x128xf32>
    %50 = vector.broadcast %49 : vector<1x1x128xf32> to vector<16x8x128xf32>
    %51 = arith.addf %47, %50 : vector<16x8x128xf32>
    %52 = vector.extract_strided_slice %0 {offsets = [4, 0], sizes = [1, 128], strides = [1, 1]} : vector<24x256xf32> to vector<1x128xf32>
    %53 = vector.extract_strided_slice %0 {offsets = [5, 0], sizes = [1, 128], strides = [1, 1]} : vector<24x256xf32> to vector<1x128xf32>
    %cst_18 = arith.constant dense<0.000000e+00> : vector<16x8xf32>
    %54 = vector.multi_reduction <add>, %51, %cst_18 [2] : vector<16x8x128xf32> to vector<16x8xf32>
    %55 = vector.shape_cast %54 : vector<16x8xf32> to vector<16x8x1xf32>
    %cst_19 = arith.constant 1.280000e+02 : f32
    %56 = vector.broadcast %cst_19 : f32 to vector<16x8x1xf32>
    %57 = arith.divf %55, %56 : vector<16x8x1xf32>
    %58 = vector.broadcast %57 : vector<16x8x1xf32> to vector<16x8x128xf32>
    %59 = arith.subf %51, %58 : vector<16x8x128xf32>
    %60 = arith.mulf %59, %59 : vector<16x8x128xf32>
    %cst_20 = arith.constant dense<0.000000e+00> : vector<16x8xf32>
    %61 = vector.multi_reduction <add>, %60, %cst_20 [2] : vector<16x8x128xf32> to vector<16x8xf32>
    %62 = vector.shape_cast %61 : vector<16x8xf32> to vector<16x8x1xf32>
    %cst_21 = arith.constant 1.280000e+02 : f32
    %63 = vector.broadcast %cst_21 : f32 to vector<16x8x1xf32>
    %64 = arith.divf %62, %63 : vector<16x8x1xf32>
    %65 = vector.broadcast %57 : vector<16x8x1xf32> to vector<16x8x128xf32>
    %66 = arith.subf %51, %65 : vector<16x8x128xf32>
    %cst_22 = arith.constant 9.99999974E-6 : f32
    %67 = vector.broadcast %cst_22 : f32 to vector<16x8x1xf32>
    %68 = arith.addf %64, %67 : vector<16x8x1xf32>
    %69 = math.rsqrt %68 : vector<16x8x1xf32>
    %70 = vector.broadcast %69 : vector<16x8x1xf32> to vector<16x8x128xf32>
    %71 = arith.mulf %66, %70 : vector<16x8x128xf32>
    %72 = vector.shape_cast %52 : vector<1x128xf32> to vector<1x1x128xf32>
    %73 = vector.broadcast %72 : vector<1x1x128xf32> to vector<16x8x128xf32>
    %74 = arith.mulf %71, %73 : vector<16x8x128xf32>
    %75 = vector.shape_cast %53 : vector<1x128xf32> to vector<1x1x128xf32>
    %76 = vector.broadcast %75 : vector<1x1x128xf32> to vector<16x8x128xf32>
    %77 = arith.addf %74, %76 : vector<16x8x128xf32>
    %cst_23 = arith.constant 0.000000e+00 : f32
    %78 = vector.broadcast %cst_23 : f32 to vector<16x8x128xf32>
    %79 = arith.maximumf %77, %78 : vector<16x8x128xf32>
    %cst_24 = arith.constant dense<0xFF800000> : vector<16x128xf32>
    %80 = vector.multi_reduction <maximumf>, %79, %cst_24 [1] : vector<16x8x128xf32> to vector<16x128xf32>
    %81 = arith.truncf %80 : vector<16x128xf32> to vector<16x128xbf16>
    %c80 = arith.constant 80 : index
    %c0_25 = arith.constant 0 : index
    %82 = vector.load %arg3[%c80, %c0_25] : memref<976x256xbf16, #tpu.memory_space<vmem>>, vector<128x128xbf16>
    %cst_26 = arith.constant dense<0.000000e+00> : vector<16x128xf32>
    %83 = tpu.matmul %81, %82, %cst_26 {dimension_numbers = #tpu.dot_dimension_numbers<[1], [0], [0], [1], [0, 0, 1, 1], [], []>} : vector<16x128xbf16>, vector<128x128xbf16>, vector<16x128xf32> -> vector<16x128xf32>
    %84 = vector.shape_cast %83 : vector<16x128xf32> to vector<2x8x128xf32>
    %85 = vector.shape_cast %80 : vector<16x128xf32> to vector<2x8x128xf32>
    %86 = vector.extract_strided_slice %85 {offsets = [0, 0, 0], sizes = [2, 1, 128], strides = [1, 1, 1]} : vector<2x8x128xf32> to vector<2x1x128xf32>
    %87 = vector.shape_cast %86 : vector<2x1x128xf32> to vector<2x128xf32>
    %88 = arith.truncf %87 : vector<2x128xf32> to vector<2x128xbf16>
    %c80_27 = arith.constant 80 : index
    %c128_28 = arith.constant 128 : index
    %89 = vector.load %arg3[%c80_27, %c128_28] : memref<976x256xbf16, #tpu.memory_space<vmem>>, vector<128x64xbf16>
    %cst_29 = arith.constant dense<0.000000e+00> : vector<2x64xf32>
    %90 = tpu.matmul %88, %89, %cst_29 {dimension_numbers = #tpu.dot_dimension_numbers<[1], [0], [0], [1], [0, 0, 1, 1], [], []>} : vector<2x128xbf16>, vector<128x64xbf16>, vector<2x64xf32> -> vector<2x64xf32>
    %91 = vector.extract_strided_slice %84 {offsets = [0, 0, 0], sizes = [2, 8, 64], strides = [1, 1, 1]} : vector<2x8x128xf32> to vector<2x8x64xf32>
    %92 = vector.extract_strided_slice %84 {offsets = [0, 0, 64], sizes = [2, 8, 64], strides = [1, 1, 1]} : vector<2x8x128xf32> to vector<2x8x64xf32>
    %93 = vector.shape_cast %90 : vector<2x64xf32> to vector<2x1x64xf32>
    %94 = vector.broadcast %93 : vector<2x1x64xf32> to vector<2x8x64xf32>
    %95 = arith.mulf %94, %91 : vector<2x8x64xf32>
    %cst_30 = arith.constant dense<0.000000e+00> : vector<2x8xf32>
    %96 = vector.multi_reduction <add>, %95, %cst_30 [2] : vector<2x8x64xf32> to vector<2x8xf32>
    %cst_31 = arith.constant 1.250000e-01 : f32
    %97 = vector.broadcast %cst_31 : f32 to vector<2x8xf32>
    %98 = arith.mulf %96, %97 : vector<2x8xf32>
    %cst_32 = arith.constant dense<0xFF800000> : vector<2xf32>
    %99 = vector.multi_reduction <maximumf>, %98, %cst_32 [1] : vector<2x8xf32> to vector<2xf32>
    %100 = vector.shape_cast %99 : vector<2xf32> to vector<2x1xf32>
    %101 = vector.broadcast %100 : vector<2x1xf32> to vector<2x8xf32>
    %102 = arith.subf %98, %101 : vector<2x8xf32>
    %103 = math.exp %102 : vector<2x8xf32>
    %cst_33 = arith.constant dense<0.000000e+00> : vector<2xf32>
    %104 = vector.multi_reduction <add>, %103, %cst_33 [1] : vector<2x8xf32> to vector<2xf32>
    %105 = vector.shape_cast %104 : vector<2xf32> to vector<2x1xf32>
    %106 = vector.broadcast %105 : vector<2x1xf32> to vector<2x8xf32>
    %107 = arith.divf %103, %106 : vector<2x8xf32>
    %108 = vector.shape_cast %107 : vector<2x8xf32> to vector<2x8x1xf32>
    %109 = vector.broadcast %108 : vector<2x8x1xf32> to vector<2x8x64xf32>
    %110 = arith.mulf %109, %92 : vector<2x8x64xf32>
    %cst_34 = arith.constant dense<0.000000e+00> : vector<2x64xf32>
    %111 = vector.multi_reduction <add>, %110, %cst_34 [1] : vector<2x8x64xf32> to vector<2x64xf32>
    %112 = arith.truncf %111 : vector<2x64xf32> to vector<2x64xbf16>
    %c208 = arith.constant 208 : index
    %c0_35 = arith.constant 0 : index
    %113 = vector.load %arg3[%c208, %c0_35] : memref<976x256xbf16, #tpu.memory_space<vmem>>, vector<64x128xbf16>
    %cst_36 = arith.constant dense<0.000000e+00> : vector<2x128xf32>
    %114 = tpu.matmul %112, %113, %cst_36 {dimension_numbers = #tpu.dot_dimension_numbers<[1], [0], [0], [1], [0, 0, 1, 1], [], []>} : vector<2x64xbf16>, vector<64x128xbf16>, vector<2x128xf32> -> vector<2x128xf32>
    %115 = arith.truncf %114 : vector<2x128xf32> to vector<2x128xbf16>
    %c272 = arith.constant 272 : index
    %c0_37 = arith.constant 0 : index
    %116 = vector.load %arg3[%c272, %c0_37] : memref<976x256xbf16, #tpu.memory_space<vmem>>, vector<128x256xbf16>
    %cst_38 = arith.constant dense<0.000000e+00> : vector<2x256xf32>
    %117 = tpu.matmul %115, %116, %cst_38 {dimension_numbers = #tpu.dot_dimension_numbers<[1], [0], [0], [1], [0, 0, 1, 1], [], []>} : vector<2x128xbf16>, vector<128x256xbf16>, vector<2x256xf32> -> vector<2x256xf32>
    %118 = vector.extract_strided_slice %0 {offsets = [6, 0], sizes = [1, 256], strides = [1, 1]} : vector<24x256xf32> to vector<1x256xf32>
    %119 = vector.broadcast %118 : vector<1x256xf32> to vector<2x256xf32>
    %120 = arith.addf %117, %119 : vector<2x256xf32>
    %121 = vector.extract_strided_slice %0 {offsets = [7, 0], sizes = [1, 256], strides = [1, 1]} : vector<24x256xf32> to vector<1x256xf32>
    %122 = vector.extract_strided_slice %0 {offsets = [8, 0], sizes = [1, 256], strides = [1, 1]} : vector<24x256xf32> to vector<1x256xf32>
    %cst_39 = arith.constant dense<0.000000e+00> : vector<2xf32>
    %123 = vector.multi_reduction <add>, %120, %cst_39 [1] : vector<2x256xf32> to vector<2xf32>
    %124 = vector.shape_cast %123 : vector<2xf32> to vector<2x1xf32>
    %cst_40 = arith.constant 2.560000e+02 : f32
    %125 = vector.broadcast %cst_40 : f32 to vector<2x1xf32>
    %126 = arith.divf %124, %125 : vector<2x1xf32>
    %127 = vector.broadcast %126 : vector<2x1xf32> to vector<2x256xf32>
    %128 = arith.subf %120, %127 : vector<2x256xf32>
    %129 = arith.mulf %128, %128 : vector<2x256xf32>
    %cst_41 = arith.constant dense<0.000000e+00> : vector<2xf32>
    %130 = vector.multi_reduction <add>, %129, %cst_41 [1] : vector<2x256xf32> to vector<2xf32>
    %131 = vector.shape_cast %130 : vector<2xf32> to vector<2x1xf32>
    %cst_42 = arith.constant 2.560000e+02 : f32
    %132 = vector.broadcast %cst_42 : f32 to vector<2x1xf32>
    %133 = arith.divf %131, %132 : vector<2x1xf32>
    %134 = vector.broadcast %126 : vector<2x1xf32> to vector<2x256xf32>
    %135 = arith.subf %120, %134 : vector<2x256xf32>
    %cst_43 = arith.constant 9.99999974E-6 : f32
    %136 = vector.broadcast %cst_43 : f32 to vector<2x1xf32>
    %137 = arith.addf %133, %136 : vector<2x1xf32>
    %138 = math.rsqrt %137 : vector<2x1xf32>
    %139 = vector.broadcast %138 : vector<2x1xf32> to vector<2x256xf32>
    %140 = arith.mulf %135, %139 : vector<2x256xf32>
    %141 = vector.broadcast %121 : vector<1x256xf32> to vector<2x256xf32>
    %142 = arith.mulf %140, %141 : vector<2x256xf32>
    %143 = vector.broadcast %122 : vector<1x256xf32> to vector<2x256xf32>
    %144 = arith.addf %142, %143 : vector<2x256xf32>
    %cst_44 = arith.constant 0.000000e+00 : f32
    %145 = vector.broadcast %cst_44 : f32 to vector<2x256xf32>
    %146 = arith.maximumf %144, %145 : vector<2x256xf32>
    %c0_45 = arith.constant 0 : index
    %c0_46 = arith.constant 0 : index
    %147 = vector.load %arg5[%c0_45, %c0_46] : memref<2x256xf32, #tpu.memory_space<vmem>>, vector<2x256xf32>
    tpu.vector_store %arg5[%c0_45, %c0_46], %146 {strides = array<i32>} : memref<2x256xf32, #tpu.memory_space<vmem>>, vector<2x256xf32>,
    %148 = arith.truncf %146 : vector<2x256xf32> to vector<2x256xbf16>
    %c400 = arith.constant 400 : index
    %c0_47 = arith.constant 0 : index
    %149 = vector.load %arg3[%c400, %c0_47] : memref<976x256xbf16, #tpu.memory_space<vmem>>, vector<256x64xbf16>
    %cst_48 = arith.constant dense<0.000000e+00> : vector<2x64xf32>
    %150 = tpu.matmul %148, %149, %cst_48 {dimension_numbers = #tpu.dot_dimension_numbers<[1], [0], [0], [1], [0, 0, 1, 1], [], []>} : vector<2x256xbf16>, vector<256x64xbf16>, vector<2x64xf32> -> vector<2x64xf32>
    %151 = vector.extract_strided_slice %0 {offsets = [9, 0], sizes = [1, 64], strides = [1, 1]} : vector<24x256xf32> to vector<1x64xf32>
    %152 = vector.broadcast %151 : vector<1x64xf32> to vector<2x64xf32>
    %153 = arith.addf %150, %152 : vector<2x64xf32>
    %154 = vector.shape_cast %3 : vector<2x8xf32> to vector<2x8x1xf32>
    %155 = vector.extract_strided_slice %0 {offsets = [16, 0], sizes = [1, 64], strides = [1, 1]} : vector<24x256xf32> to vector<1x64xf32>
    %156 = vector.shape_cast %155 : vector<1x64xf32> to vector<1x1x64xf32>
    %157 = vector.broadcast %154 : vector<2x8x1xf32> to vector<2x8x64xf32>
    %158 = vector.broadcast %156 : vector<1x1x64xf32> to vector<2x8x64xf32>
    %159 = arith.mulf %157, %158 : vector<2x8x64xf32>
    %160 = vector.shape_cast %4 : vector<2x8xf32> to vector<2x8x1xf32>
    %161 = vector.extract_strided_slice %0 {offsets = [17, 0], sizes = [1, 64], strides = [1, 1]} : vector<24x256xf32> to vector<1x64xf32>
    %162 = vector.shape_cast %161 : vector<1x64xf32> to vector<1x1x64xf32>
    %163 = vector.broadcast %160 : vector<2x8x1xf32> to vector<2x8x64xf32>
    %164 = vector.broadcast %162 : vector<1x1x64xf32> to vector<2x8x64xf32>
    %165 = arith.mulf %163, %164 : vector<2x8x64xf32>
    %166 = arith.addf %159, %165 : vector<2x8x64xf32>
    %167 = vector.shape_cast %153 : vector<2x64xf32> to vector<2x1x64xf32>
    %168 = vector.broadcast %167 : vector<2x1x64xf32> to vector<2x8x64xf32>
    %169 = arith.addf %168, %166 : vector<2x8x64xf32>
    %170 = vector.extract_strided_slice %0 {offsets = [10, 0], sizes = [1, 64], strides = [1, 1]} : vector<24x256xf32> to vector<1x64xf32>
    %171 = vector.extract_strided_slice %0 {offsets = [11, 0], sizes = [1, 64], strides = [1, 1]} : vector<24x256xf32> to vector<1x64xf32>
    %cst_49 = arith.constant dense<0.000000e+00> : vector<2x8xf32>
    %172 = vector.multi_reduction <add>, %169, %cst_49 [2] : vector<2x8x64xf32> to vector<2x8xf32>
    %173 = vector.shape_cast %172 : vector<2x8xf32> to vector<2x8x1xf32>
    %cst_50 = arith.constant 6.400000e+01 : f32
    %174 = vector.broadcast %cst_50 : f32 to vector<2x8x1xf32>
    %175 = arith.divf %173, %174 : vector<2x8x1xf32>
    %176 = vector.broadcast %175 : vector<2x8x1xf32> to vector<2x8x64xf32>
    %177 = arith.subf %169, %176 : vector<2x8x64xf32>
    %178 = arith.mulf %177, %177 : vector<2x8x64xf32>
    %cst_51 = arith.constant dense<0.000000e+00> : vector<2x8xf32>
    %179 = vector.multi_reduction <add>, %178, %cst_51 [2] : vector<2x8x64xf32> to vector<2x8xf32>
    %180 = vector.shape_cast %179 : vector<2x8xf32> to vector<2x8x1xf32>
    %cst_52 = arith.constant 6.400000e+01 : f32
    %181 = vector.broadcast %cst_52 : f32 to vector<2x8x1xf32>
    %182 = arith.divf %180, %181 : vector<2x8x1xf32>
    %183 = vector.broadcast %175 : vector<2x8x1xf32> to vector<2x8x64xf32>
    %184 = arith.subf %169, %183 : vector<2x8x64xf32>
    %cst_53 = arith.constant 9.99999974E-6 : f32
    %185 = vector.broadcast %cst_53 : f32 to vector<2x8x1xf32>
    %186 = arith.addf %182, %185 : vector<2x8x1xf32>
    %187 = math.rsqrt %186 : vector<2x8x1xf32>
    %188 = vector.broadcast %187 : vector<2x8x1xf32> to vector<2x8x64xf32>
    %189 = arith.mulf %184, %188 : vector<2x8x64xf32>
    %190 = vector.shape_cast %170 : vector<1x64xf32> to vector<1x1x64xf32>
    %191 = vector.broadcast %190 : vector<1x1x64xf32> to vector<2x8x64xf32>
    %192 = arith.mulf %189, %191 : vector<2x8x64xf32>
    %193 = vector.shape_cast %171 : vector<1x64xf32> to vector<1x1x64xf32>
    %194 = vector.broadcast %193 : vector<1x1x64xf32> to vector<2x8x64xf32>
    %195 = arith.addf %192, %194 : vector<2x8x64xf32>
    %cst_54 = arith.constant 0.000000e+00 : f32
    %196 = vector.broadcast %cst_54 : f32 to vector<2x8x64xf32>
    %197 = arith.maximumf %195, %196 : vector<2x8x64xf32>
    %198 = vector.shape_cast %197 : vector<2x8x64xf32> to vector<16x64xf32>
    %199 = arith.truncf %198 : vector<16x64xf32> to vector<16x64xbf16>
    %c656 = arith.constant 656 : index
    %c0_55 = arith.constant 0 : index
    %200 = vector.load %arg3[%c656, %c0_55] : memref<976x256xbf16, #tpu.memory_space<vmem>>, vector<64x256xbf16>
    %cst_56 = arith.constant dense<0.000000e+00> : vector<16x256xf32>
    %201 = tpu.matmul %199, %200, %cst_56 {dimension_numbers = #tpu.dot_dimension_numbers<[1], [0], [0], [1], [0, 0, 1, 1], [], []>} : vector<16x64xbf16>, vector<64x256xbf16>, vector<16x256xf32> -> vector<16x256xf32>
    %202 = vector.extract_strided_slice %0 {offsets = [12, 0], sizes = [1, 256], strides = [1, 1]} : vector<24x256xf32> to vector<1x256xf32>
    %203 = vector.broadcast %202 : vector<1x256xf32> to vector<16x256xf32>
    %204 = arith.addf %201, %203 : vector<16x256xf32>
    %205 = vector.extract_strided_slice %204 {offsets = [0, 0], sizes = [16, 128], strides = [1, 1]} : vector<16x256xf32> to vector<16x128xf32>
    %206 = vector.extract_strided_slice %0 {offsets = [13, 0], sizes = [1, 128], strides = [1, 1]} : vector<24x256xf32> to vector<1x128xf32>
    %207 = vector.extract_strided_slice %0 {offsets = [14, 0], sizes = [1, 128], strides = [1, 1]} : vector<24x256xf32> to vector<1x128xf32>
    %cst_57 = arith.constant dense<0.000000e+00> : vector<16xf32>
    %208 = vector.multi_reduction <add>, %205, %cst_57 [1] : vector<16x128xf32> to vector<16xf32>
    %209 = vector.shape_cast %208 : vector<16xf32> to vector<16x1xf32>
    %cst_58 = arith.constant 1.280000e+02 : f32
    %210 = vector.broadcast %cst_58 : f32 to vector<16x1xf32>
    %211 = arith.divf %209, %210 : vector<16x1xf32>
    %212 = vector.broadcast %211 : vector<16x1xf32> to vector<16x128xf32>
    %213 = arith.subf %205, %212 : vector<16x128xf32>
    %214 = arith.mulf %213, %213 : vector<16x128xf32>
    %cst_59 = arith.constant dense<0.000000e+00> : vector<16xf32>
    %215 = vector.multi_reduction <add>, %214, %cst_59 [1] : vector<16x128xf32> to vector<16xf32>
    %216 = vector.shape_cast %215 : vector<16xf32> to vector<16x1xf32>
    %cst_60 = arith.constant 1.280000e+02 : f32
    %217 = vector.broadcast %cst_60 : f32 to vector<16x1xf32>
    %218 = arith.divf %216, %217 : vector<16x1xf32>
    %219 = vector.broadcast %211 : vector<16x1xf32> to vector<16x128xf32>
    %220 = arith.subf %205, %219 : vector<16x128xf32>
    %cst_61 = arith.constant 9.99999974E-6 : f32
    %221 = vector.broadcast %cst_61 : f32 to vector<16x1xf32>
    %222 = arith.addf %218, %221 : vector<16x1xf32>
    %223 = math.rsqrt %222 : vector<16x1xf32>
    %224 = vector.broadcast %223 : vector<16x1xf32> to vector<16x128xf32>
    %225 = arith.mulf %220, %224 : vector<16x128xf32>
    %226 = vector.broadcast %206 : vector<1x128xf32> to vector<16x128xf32>
    %227 = arith.mulf %225, %226 : vector<16x128xf32>
    %228 = vector.broadcast %207 : vector<1x128xf32> to vector<16x128xf32>
    %229 = arith.addf %227, %228 : vector<16x128xf32>
    %cst_62 = arith.constant 0.000000e+00 : f32
    %230 = vector.broadcast %cst_62 : f32 to vector<16x128xf32>
    %231 = arith.maximumf %229, %230 : vector<16x128xf32>
    %232 = vector.extract_strided_slice %204 {offsets = [0, 128], sizes = [16, 128], strides = [1, 1]} : vector<16x256xf32> to vector<16x128xf32>
    %233 = vector.extract_strided_slice %0 {offsets = [13, 128], sizes = [1, 128], strides = [1, 1]} : vector<24x256xf32> to vector<1x128xf32>
    %234 = vector.extract_strided_slice %0 {offsets = [14, 128], sizes = [1, 128], strides = [1, 1]} : vector<24x256xf32> to vector<1x128xf32>
    %cst_63 = arith.constant dense<0.000000e+00> : vector<16xf32>
    %235 = vector.multi_reduction <add>, %232, %cst_63 [1] : vector<16x128xf32> to vector<16xf32>
    %236 = vector.shape_cast %235 : vector<16xf32> to vector<16x1xf32>
    %cst_64 = arith.constant 1.280000e+02 : f32
    %237 = vector.broadcast %cst_64 : f32 to vector<16x1xf32>
    %238 = arith.divf %236, %237 : vector<16x1xf32>
    %239 = vector.broadcast %238 : vector<16x1xf32> to vector<16x128xf32>
    %240 = arith.subf %232, %239 : vector<16x128xf32>
    %241 = arith.mulf %240, %240 : vector<16x128xf32>
    %cst_65 = arith.constant dense<0.000000e+00> : vector<16xf32>
    %242 = vector.multi_reduction <add>, %241, %cst_65 [1] : vector<16x128xf32> to vector<16xf32>
    %243 = vector.shape_cast %242 : vector<16xf32> to vector<16x1xf32>
    %cst_66 = arith.constant 1.280000e+02 : f32
    %244 = vector.broadcast %cst_66 : f32 to vector<16x1xf32>
    %245 = arith.divf %243, %244 : vector<16x1xf32>
    %246 = vector.broadcast %238 : vector<16x1xf32> to vector<16x128xf32>
    %247 = arith.subf %232, %246 : vector<16x128xf32>
    %cst_67 = arith.constant 9.99999974E-6 : f32
    %248 = vector.broadcast %cst_67 : f32 to vector<16x1xf32>
    %249 = arith.addf %245, %248 : vector<16x1xf32>
    %250 = math.rsqrt %249 : vector<16x1xf32>
    %251 = vector.broadcast %250 : vector<16x1xf32> to vector<16x128xf32>
    %252 = arith.mulf %247, %251 : vector<16x128xf32>
    %253 = vector.broadcast %233 : vector<1x128xf32> to vector<16x128xf32>
    %254 = arith.mulf %252, %253 : vector<16x128xf32>
    %255 = vector.broadcast %234 : vector<1x128xf32> to vector<16x128xf32>
    %256 = arith.addf %254, %255 : vector<16x128xf32>
    %cst_68 = arith.constant 0.000000e+00 : f32
    %257 = vector.broadcast %cst_68 : f32 to vector<16x128xf32>
    %258 = arith.maximumf %256, %257 : vector<16x128xf32>
    %259 = tpu.concatenate %231, %258 in 1 : vector<16x128xf32>, vector<16x128xf32> -> vector<16x256xf32>
    %260 = arith.truncf %259 : vector<16x256xf32> to vector<16x256xbf16>
    %c720 = arith.constant 720 : index
    %c0_69 = arith.constant 0 : index
    %261 = vector.load %arg3[%c720, %c0_69] : memref<976x256xbf16, #tpu.memory_space<vmem>>, vector<256x128xbf16>
    %cst_70 = arith.constant dense<0.000000e+00> : vector<16x128xf32>
    %262 = tpu.matmul %260, %261, %cst_70 {dimension_numbers = #tpu.dot_dimension_numbers<[1], [0], [0], [1], [0, 0, 1, 1], [], []>} : vector<16x256xbf16>, vector<256x128xbf16>, vector<16x128xf32> -> vector<16x128xf32>
    %263 = vector.extract_strided_slice %0 {offsets = [15, 0], sizes = [1, 128], strides = [1, 1]} : vector<24x256xf32> to vector<1x128xf32>
    %264 = vector.broadcast %263 : vector<1x128xf32> to vector<16x128xf32>
    %265 = arith.addf %262, %264 : vector<16x128xf32>
    %c0_71 = arith.constant 0 : index
    %c0_72 = arith.constant 0 : index
    %266 = vector.load %arg6[%c0_71, %c0_72] : memref<16x128xf32, #tpu.memory_space<vmem>>, vector<16x128xf32>
    tpu.vector_store %arg6[%c0_71, %c0_72], %265 {strides = array<i32>} : memref<16x128xf32, #tpu.memory_space<vmem>>, vector<16x128xf32>,
    return
  }
  func.func @transform_0(%arg0: i32) -> (i32, i32) {
    %c0_i32 = arith.constant 0 : i32
    %c0_i32_0 = arith.constant 0 : i32
    return %arg0, %c0_i32 : i32, i32
  }
  func.func @transform_1(%arg0: i32) -> (i32, i32) {
    %c0_i32 = arith.constant 0 : i32
    %c0_i32_0 = arith.constant 0 : i32
    return %arg0, %c0_i32 : i32, i32
  }
  func.func @transform_2(%arg0: i32) -> (i32, i32) {
    %c0_i32 = arith.constant 0 : i32
    %c0_i32_0 = arith.constant 0 : i32
    %c0_i32_1 = arith.constant 0 : i32
    return %c0_i32, %c0_i32_0 : i32, i32
  }
  func.func @transform_3(%arg0: i32) -> (i32, i32) {
    %c0_i32 = arith.constant 0 : i32
    %c0_i32_0 = arith.constant 0 : i32
    %c0_i32_1 = arith.constant 0 : i32
    return %c0_i32, %c0_i32_0 : i32, i32
  }
  func.func @transform_4(%arg0: i32) -> (i32, i32) {
    %c0_i32 = arith.constant 0 : i32
    %c0_i32_0 = arith.constant 0 : i32
    return %arg0, %c0_i32 : i32, i32
  }
  func.func @transform_5(%arg0: i32) -> (i32, i32) {
    %c0_i32 = arith.constant 0 : i32
    %c0_i32_0 = arith.constant 0 : i32
    return %arg0, %c0_i32 : i32, i32
  }
}

</mosaic_0001>

<bundles_post_ra>
// kernel: tpu_custom_call.1
= control target key start
LH: loop header
LB: loop body
LE: loop exit
PB: predicated region body
PF: predicated region fallthrough
CT: control target
= control target key end

     0   :  { %11 = vsyncpa [#allocation3], 0  ;;  %s4272_s0 = inlined_call_operand.vmem [shape: bf16[128,16], index: 0, kind: input, shape index: {}]   ;;  %s4273_s1 = inlined_call_operand.vmem [shape: f32[2,16], index: 1, kind: input, shape index: {}]   ;;  %s4274_s2 = inlined_call_operand.hbm [shape: bf16[976,256], index: 2, kind: input, shape index: {}]   ;;  %s4275_s3 = inlined_call_operand.vmem [shape: f32[24,256], index: 3, kind: input, shape index: {}]   ;;  %s4276_s4 = inlined_call_operand.hbm [shape: f32[2,256], index: 4, kind: output, shape index: {0}]   ;;  %s4277_s5 = inlined_call_operand.hbm [shape: f32[16,128], index: 5, kind: output, shape index: {1}]  }
   0x1   :  { %12 = vsyncpa [#allocation4], 0 }
   0x2   :  { %13 = vsyncpa [#allocation7], 0  ;;  %s3425_s18 = smov [#allocation2]   ;;  %s3353_s22 = scalar_lea.hbm %s4274_s2, 15616 }
   0x3   :  { %s23_s19 = sshll.u32 %s3425_s18, 4  ;;  %p3354_p0 = scmp.ne.s32.totalorder %s4274_s2, %s3353_s22  ;;  %s24_s19 = int_to_ptr.vmem [resolvable:$true] %s23_s19 }
   0x4   :  { %p3357_p1 = scmp.lt.u32.totalorder %s3353_s22, %s4274_s2 }
   0x6   :  { %p3359_p2 = pnand %p3357_p1, %p3354_p0 }
   0x8   :  { %3362 = shalt.err (!%p3359_p2)
}
   0x9   :  { %s3363_s27 = scalar_lea.vmem %s24_s19, 15616  ;;  %p3368_p4 = scmp.lt.s32.totalorder %s24_s19, %s24_s19 }
   0xa   :  { %p3364_p3 = scmp.ne.s32.totalorder %s24_s19, %s3363_s27  ;;  %p3369_p5 = scmp.lt.s32.totalorder %s3363_s27, %s3363_s27 }
   0xc   :  { %p3370_p6 = por %p3369_p5, %p3368_p4 }
   0xe   :  { %p3371_p7 = pnand %p3370_p6, %p3364_p3 }
  0x10   :  { %3374 = shalt.err (!%p3371_p7)
}
  0x11   :  { %s3426_s28 = smov 128   ;;  %s3427_s29 = smov 8  }
  0x12   :  { %29 = dma.hbm_to_vmem [thread:$0]  %s4274_s2, 15616, %s24_s19, [#allocation3], %s3426_s28, %s3426_s28, %s3427_s29  }
  0x13   :  { %3419 = dma.done.wait [#allocation3], 15616  }
  0x14   :  { %3420 = vsyncadd [#allocation3], 4294951680  ;;  %v3160_v0 = vld [vmem:[#allocation2] ss:$8 sps:$4 sm:$0xff]   ;;  %v3161_v1 = vld [vmem:[%s4272_s0] sm:$0xff]   ;;  %vm110_vm0 = vcmask 130048   ;;  %v60_v9 = vlaneseq }
  0x15   :  { %3040 = vmatprep.subr.bf16.mxu0 %v3160_v0  ;;  %3146 = vmatprep.subr.bf16.mxu1 %v3160_v0  ;;  %v3162_v2 = vld [vmem:[%s4272_s0 + $0x20] sm:$0xff]   ;;  %v3163_v3 = vld [vmem:[%s4272_s0 + $0x8] sm:$0xff]   ;;  %v3165_v5 = vld [vmem:[%s4272_s0 + $0x10] sm:$0xff]   ;;  %vm232_vm1 = vcmask 523264   ;;  %vm3429_vm2 = vmmov 0   ;;  %vm827_vm3 = vcmask 1041409  }
  0x16   :  { %3041 = vmatpush3.bf16.msra.mxu0 %v3160_v0  ;;  %3147 = vmatpush3.bf16.msra.mxu1 %v3160_v0  ;;  %v3164_v4 = vld [vmem:[%s4272_s0 + $0x28] sm:$0xff]   ;;  %v3166_v6 = vld [vmem:[%s4272_s0 + $0x30] sm:$0xff]   ;;  %v3167_v7 = vld [vmem:[%s4272_s0 + $0x18] sm:$0xff]   ;;  %v3513_v10 = vshrl.u32 %v60_v9, 7  ;;  %vm829_vm4 = vcmask 1042434   ;;  %vm831_vm5 = vcmask 1043459  }
  0x17   :  { %3042 = vmatprep.mubr.msk.bf16.mxu0 %vm110_vm0, %v3161_v1  ;;  %3050 = vmatprep.mubr.msk.bf16.mxu1 %vm110_vm0, %v3162_v2  ;;  %v3168_v8 = vld [vmem:[%s4272_s0 + $0x38] sm:$0xff]   ;;  %v3521_v12 = vld [vmem:[%s4275_s3] sm:$0xff]  ;;  %vm833_vm6 = vcmask 1044484   ;;  %vm835_vm7 = vcmask 1045509   ;;  %vm837_vm8 = vcmask 1046534   ;;  %vm839_vm9 = vcmask 1047559  }
  0x18   :  { %v3516_v11 = vsub.s32 0, %v3513_v10  ;;  %vm1795_vm10 = vcmask 58368   ;;  %vm1864_vm11 = vcmask 1048064   ;;  %s3432_s25 = smov 64   ;;  %vm2110_vm12 = vcmask 1041408  }
  0x19   :  { %3043 = vmatmul.mubr.msk.bf16.vlgmr.msra.gmra.mrb[0].mxu0 %vm110_vm0, %v3163_v3  ;;  %3051 = vmatmul.mubr.msk.bf16.vlgmr.msra.gmra.mrb[0].mxu1 %vm110_vm0, %v3164_v4 }
  0x1a   :  { %3046 = vmatprep.mubr.msk.bf16.mxu0 %vm110_vm0, %v3165_v5  ;;  %3054 = vmatprep.mubr.msk.bf16.mxu1 %vm110_vm0, %v3166_v6  ;;  %v63_v13 = vrot.slane %v3521_v12, %v3516_v11 }
  0x21   :  { %3047 = vmatmul.mubr.msk.bf16.gmra.mrb[4].mxu0 %vm110_vm0, %v3167_v7  ;;  %3055 = vmatmul.mubr.msk.bf16.gmra.mrb[4].mxu1 %vm110_vm0, %v3168_v8 }
  0xec   :  { %v3044_v14 = vpop.f32.mrb[0].mxu0  ;;  %v3052_v15 = vpop.f32.mrb[0].mxu1 }
  0xed   :  { %v3525_v16 = vadd.f32 %v3044_v14, %v63_v13  ;;  %v3527_v17 = vadd.f32 %v3052_v15, %v63_v13  ;;  %v169_v18 = vpop.f32.mrb[1].mxu0  ;;  %v201_v19 = vpop.f32.mrb[1].mxu1 }
  0xee   :  { %v3045_v20 = vpop.f32.mrb[2].mxu0  ;;  %v3053_v21 = vpop.f32.mrb[2].mxu1  ;;  %v3529_v22 = vadd.f32 %v169_v18, %v63_v13  ;;  %v3531_v23 = vadd.f32 %v201_v19, %v63_v13 }
  0xef   :  { %v172_v24 = vpop.f32.mrb[3].mxu0  ;;  %v204_v25 = vpop.f32.mrb[3].mxu1  ;;  %v263_v26 = vsel %vm232_vm1, %v3527_v17, 0.0  ;;  %v239_v27 = vsel %vm232_vm1, %v3525_v16, 0.0  ;;  %v3537_v28 = vadd.f32 %v3045_v20, %v63_v13  ;;  %v3539_v29 = vadd.f32 %v3053_v21, %v63_v13 }
  0xf0   :  { %264 = vadd.xlane.f32.xlu1 %v263_v26  ;;  %240 = vadd.xlane.f32.xlu0 %v239_v27  ;;  %v257_v30 = vsel %vm232_vm1, %v3531_v23, 0.0  ;;  %v233_v31 = vsel %vm232_vm1, %v3529_v22, 0.0  ;;  %v3545_v38 = vadd.f32 %v172_v24, %v63_v13  ;;  %v3547_v39 = vadd.f32 %v204_v25, %v63_v13 }
  0xf1   :  { %v266_v40 = vsel %vm232_vm1, %v3539_v29, 0.0  ;;  %v242_v41 = vsel %vm232_vm1, %v3537_v28, 0.0 }
  0xf2   :  { %v260_v46 = vsel %vm232_vm1, %v3547_v39, 0.0  ;;  %v236_v47 = vsel %vm232_vm1, %v3545_v38, 0.0 }
  0xf4   :  { %258 = vadd.xlane.f32.xlu1 %v257_v30  ;;  %234 = vadd.xlane.f32.xlu0 %v233_v31  ;;  %v3048_v32 = vpop.f32.mrb[4].mxu0  ;;  %v3056_v33 = vpop.f32.mrb[4].mxu1 }
  0xf5   :  { %v185_v34 = vpop.f32.mrb[5].mxu0  ;;  %v217_v35 = vpop.f32.mrb[5].mxu1  ;;  %v3553_v44 = vadd.f32 %v3048_v32, %v63_v13  ;;  %v3555_v45 = vadd.f32 %v3056_v33, %v63_v13 }
  0xf6   :  { %v3049_v36 = vpop.f32.mrb[6].mxu0  ;;  %v3057_v37 = vpop.f32.mrb[6].mxu1  ;;  %v3561_v48 = vadd.f32 %v185_v34, %v63_v13  ;;  %v3563_v49 = vadd.f32 %v217_v35, %v63_v13 }
  0xf7   :  { %v188_v42 = vpop.f32.mrb[7].mxu0  ;;  %v220_v43 = vpop.f32.mrb[7].mxu1  ;;  %v275_v50 = vsel %vm232_vm1, %v3555_v45, 0.0  ;;  %v251_v51 = vsel %vm232_vm1, %v3553_v44, 0.0  ;;  %v3577_v56 = vadd.f32 %v3049_v36, %v63_v13  ;;  %v3579_v57 = vadd.f32 %v3057_v37, %v63_v13 }
  0xf8   :  { %267 = vadd.xlane.f32.xlu1 %v266_v40  ;;  %243 = vadd.xlane.f32.xlu0 %v242_v41  ;;  %v269_v52 = vsel %vm232_vm1, %v3563_v49, 0.0  ;;  %v245_v53 = vsel %vm232_vm1, %v3561_v48, 0.0  ;;  %v3573_v54 = vadd.f32 %v188_v42, %v63_v13  ;;  %v3575_v55 = vadd.f32 %v220_v43, %v63_v13 }
  0xf9   :  { %v278_v60 = vsel %vm232_vm1, %v3579_v57, 0.0  ;;  %v254_v61 = vsel %vm232_vm1, %v3577_v56, 0.0 }
  0xfa   :  { %v272_v58 = vsel %vm232_vm1, %v3575_v55, 0.0  ;;  %v248_v59 = vsel %vm232_vm1, %v3573_v54, 0.0 }
  0xfc   :  { %261 = vadd.xlane.f32.xlu1 %v260_v46  ;;  %237 = vadd.xlane.f32.xlu0 %v236_v47 }
 0x100   :  { %276 = vadd.xlane.f32.xlu1 %v275_v50  ;;  %252 = vadd.xlane.f32.xlu0 %v251_v51 }
 0x104   :  { %270 = vadd.xlane.f32.xlu1 %v269_v52  ;;  %246 = vadd.xlane.f32.xlu0 %v245_v53 }
 0x108   :  { %273 = vadd.xlane.f32.xlu1 %v272_v58  ;;  %249 = vadd.xlane.f32.xlu0 %v248_v59 }
 0x10c   :  { %279 = vadd.xlane.f32.xlu1 %v278_v60  ;;  %255 = vadd.xlane.f32.xlu0 %v254_v61 }
 0x17d   :  { %v265_v62 = vpop.xlane.xlu1 %264  ;;  %v241_v63 = vpop.xlane.xlu0 %240 }
 0x17e   :  { %v292_v0 = vmul.f32 0.015625, %v265_v62  ;;  %v284_v1 = vmul.f32 0.015625, %v241_v63 }
 0x180   :  { %v3590_v2 = vsub.f32 %v3527_v17, %v292_v0  ;;  %v3593_v3 = vsub.f32 %v3525_v16, %v284_v1 }
 0x181   :  { %v259_v4 = vpop.xlane.xlu1 %258  ;;  %v235_v5 = vpop.xlane.xlu0 %234 }
 0x182   :  { %v290_v6 = vmul.f32 0.015625, %v259_v4  ;;  %v282_v7 = vmul.f32 0.015625, %v235_v5  ;;  %v324_v8 = vmul.f32 %v3590_v2, %v3590_v2  ;;  %v316_v13 = vmul.f32 %v3593_v3, %v3593_v3 }
 0x184   :  { %v3600_v14 = vsub.f32 %v3531_v23, %v290_v6  ;;  %v3603_v15 = vsub.f32 %v3529_v22, %v282_v7  ;;  %v360_v17 = vsel %vm232_vm1, %v324_v8, 0.0  ;;  %v336_v16 = vsel %vm232_vm1, %v316_v13, 0.0 }
 0x185   :  { %361 = vadd.xlane.f32.xlu1 %v360_v17  ;;  %v268_v18 = vpop.xlane.xlu1 %267  ;;  %337 = vadd.xlane.f32.xlu0 %v336_v16  ;;  %v244_v19 = vpop.xlane.xlu0 %243 }
 0x186   :  { %v293_v20 = vmul.f32 0.015625, %v268_v18  ;;  %v285_v21 = vmul.f32 0.015625, %v244_v19  ;;  %v314_v24 = vmul.f32 %v3603_v15, %v3603_v15  ;;  %v322_v23 = vmul.f32 %v3600_v14, %v3600_v14 }
 0x188   :  { %v3612_v25 = vsub.f32 %v3539_v29, %v293_v20  ;;  %v3615_v22 = vsub.f32 %v3537_v28, %v285_v21  ;;  %v330_v26 = vsel %vm232_vm1, %v314_v24, 0.0  ;;  %v354_v34 = vsel %vm232_vm1, %v322_v23, 0.0 }
 0x189   :  { %v262_v27 = vpop.xlane.xlu1 %261  ;;  %331 = vadd.xlane.f32.xlu0 %v330_v26  ;;  %v238_v30 = vpop.xlane.xlu0 %237 }
 0x18a   :  { %v291_v31 = vmul.f32 0.015625, %v262_v27  ;;  %v283_v32 = vmul.f32 0.015625, %v238_v30  ;;  %v325_v33 = vmul.f32 %v3612_v25, %v3612_v25  ;;  %v317_v36 = vmul.f32 %v3615_v22, %v3615_v22  ;;  %v3169_v30 = vld [vmem:[#allocation2 + $0x10] ss:$8 sps:$4 sm:$0xff]  }
 0x18b   :  { %3058 = vmatprep.subr.bf16.mxu1 %v3169_v30 }
 0x18c   :  { %v3622_v35 = vsub.f32 %v3547_v39, %v291_v31  ;;  %v3625_v29 = vsub.f32 %v3545_v38, %v283_v32  ;;  %v363_v28 = vsel %vm232_vm1, %v325_v33, 0.0  ;;  %v339_v47 = vsel %vm232_vm1, %v317_v36, 0.0  ;;  %3059 = vmatpush3.bf16.msra.mxu1 %v3169_v30  ;;  %v3170_v31 = vld [vmem:[#allocation2 + $0x20] ss:$8 sps:$4 sm:$0xff]   ;;  %v3171_v32 = vld [vmem:[#allocation2 + $0x30] ss:$8 sps:$4 sm:$0xff]  }
 0x18d   :  { %364 = vadd.xlane.f32.xlu1 %v363_v28  ;;  %v277_v37 = vpop.xlane.xlu1 %276  ;;  %355 = vadd.xlane.f32.xlu0 %v354_v34  ;;  %v253_v40 = vpop.xlane.xlu0 %252  ;;  %v3172_v33 = vld [vmem:[#allocation2 + $0x40] ss:$8 sps:$4 sm:$0xff]   ;;  %v3173_v34 = vld [vmem:[#allocation2 + $0x14] ss:$8 sps:$4 sm:$0xff]   ;;  %v3428_v28 = vmov 0.0  }
 0x18e   :  { %v296_v41 = vmul.f32 0.015625, %v277_v37  ;;  %v288_v42 = vmul.f32 0.015625, %v253_v40  ;;  %v315_v43 = vmul.f32 %v3625_v29, %v3625_v29  ;;  %v323_v39 = vmul.f32 %v3622_v35, %v3622_v35  ;;  %3060 = vmatprep.subr.bf16.mxu1 %v3170_v31  ;;  %3082 = vmatprep.subr.bf16.mxu0 %v3428_v28  ;;  %v3174_v36 = vld [vmem:[#allocation2 + $0x24] ss:$8 sps:$4 sm:$0xff]   ;;  %v3175_v37 = vld [vmem:[#allocation2 + $0x34] ss:$8 sps:$4 sm:$0xff]  }
 0x18f   :  { %3083 = vmatpush3.bf16.msra.mxu0 %v3173_v34  ;;  %3090 = vmatprep.mubr.msk.bf16.mxu0 %vm3429_vm2, %v3428_v28  ;;  %v3176_v40 = vld [vmem:[#allocation2 + $0x44] ss:$8 sps:$4 sm:$0xff]  }
 0x190   :  { %v3635_v38 = vsub.f32 %v3555_v45, %v296_v41  ;;  %v3638_v46 = vsub.f32 %v3553_v44, %v288_v42  ;;  %v333_v50 = vsel %vm232_vm1, %v315_v43, 0.0  ;;  %v357_v60 = vsel %vm232_vm1, %v323_v39, 0.0  ;;  %3061 = vmatpush3.bf16.msra.mxu1 %v3170_v31  ;;  %3084 = vmatprep.subr.bf16.mxu0 %v3428_v28 }
 0x191   :  { %v271_v51 = vpop.xlane.xlu1 %270  ;;  %340 = vadd.xlane.f32.xlu0 %v339_v47  ;;  %334 = vadd.xlane.f32.xlu1 %v333_v50  ;;  %v247_v52 = vpop.xlane.xlu0 %246 }
 0x192   :  { %v294_v53 = vmul.f32 0.015625, %v271_v51  ;;  %v286_v58 = vmul.f32 0.015625, %v247_v52  ;;  %v320_v59 = vmul.f32 %v3638_v46, %v3638_v46  ;;  %v328_v62 = vmul.f32 %v3635_v38, %v3635_v38  ;;  %3062 = vmatprep.subr.bf16.mxu1 %v3171_v32 }
 0x193   :  { %3085 = vmatpush3.bf16.msra.mxu0 %v3174_v36 }
 0x194   :  { %v3646_v45 = vsub.f32 %v3563_v49, %v294_v53  ;;  %v3649_v44 = vsub.f32 %v3561_v48, %v286_v58  ;;  %v348_v61 = vsel %vm232_vm1, %v320_v59, 0.0  ;;  %v372_v7 = vsel %vm232_vm1, %v328_v62, 0.0  ;;  %3063 = vmatpush3.bf16.msra.mxu1 %v3171_v32  ;;  %3086 = vmatprep.subr.bf16.mxu0 %v3428_v28 }
 0x195   :  { %v274_v63 = vpop.xlane.xlu1 %273  ;;  %358 = vadd.xlane.f32.xlu1 %v357_v60  ;;  %349 = vadd.xlane.f32.xlu0 %v348_v61  ;;  %v250_v0 = vpop.xlane.xlu0 %249  ;;  %v3694_v59 = vsub.s32 1, %v3513_v10  ;;  %v464_v62 = vsub.s32 2, %v3513_v10 }
 0x196   :  { %v295_v1 = vmul.f32 0.015625, %v274_v63  ;;  %v287_v4 = vmul.f32 0.015625, %v250_v0  ;;  %v318_v5 = vmul.f32 %v3649_v44, %v3649_v44  ;;  %v326_v49 = vmul.f32 %v3646_v45, %v3646_v45  ;;  %3064 = vmatprep.subr.bf16.mxu1 %v3172_v33 }
 0x197   :  { %3087 = vmatpush3.bf16.msra.mxu0 %v3175_v37 }
 0x198   :  { %v3659_v48 = vsub.f32 %v3575_v55, %v295_v1  ;;  %v3662_v6 = vsub.f32 %v3573_v54, %v287_v4  ;;  %v342_v8 = vsel %vm232_vm1, %v318_v5, 0.0  ;;  %v366_v20 = vsel %vm232_vm1, %v326_v49, 0.0  ;;  %3065 = vmatpush3.bf16.msra.mxu1 %v3172_v33  ;;  %3088 = vmatprep.subr.bf16.mxu0 %v3428_v28 }
 0x199   :  { %v280_v13 = vpop.xlane.xlu1 %279  ;;  %373 = vadd.xlane.f32.xlu1 %v372_v7  ;;  %343 = vadd.xlane.f32.xlu0 %v342_v8  ;;  %v256_v17 = vpop.xlane.xlu0 %255  ;;  %v3699_v5 = vrot.slane %v3521_v12, %v3694_v59 }
 0x19a   :  { %v297_v16 = vmul.f32 0.015625, %v280_v13  ;;  %v289_v18 = vmul.f32 0.015625, %v256_v17  ;;  %v319_v19 = vmul.f32 %v3662_v6, %v3662_v6  ;;  %v327_v24 = vmul.f32 %v3659_v48, %v3659_v48  ;;  %3094 = vmatprep.subr.bf16.mxu1 %v3428_v28 }
 0x19b   :  { %3089 = vmatpush3.bf16.msra.mxu0 %v3176_v40  ;;  %v3704_v17 = vrot.slane %v3521_v12, %v464_v62 }
 0x19c   :  { %v3670_v55 = vsub.f32 %v3579_v57, %v297_v16  ;;  %v3673_v54 = vsub.f32 %v3577_v56, %v289_v18  ;;  %v345_v21 = vsel %vm232_vm1, %v319_v19, 0.0  ;;  %v369_v26 = vsel %vm232_vm1, %v327_v24, 0.0  ;;  %3114 = vmatprep.subr.bf16.mxu0 %v3428_v28 }
 0x19d   :  { %367 = vadd.xlane.f32.xlu1 %v366_v20  ;;  %346 = vadd.xlane.f32.xlu0 %v345_v21 }
 0x19e   :  { %v321_v23 = vmul.f32 %v3673_v54, %v3673_v54  ;;  %v329_v57 = vmul.f32 %v3670_v55, %v3670_v55 }
 0x1a0   :  { %v351_v27 = vsel %vm232_vm1, %v321_v23, 0.0  ;;  %v375_v56 = vsel %vm232_vm1, %v329_v57, 0.0 }
 0x1a1   :  { %370 = vadd.xlane.f32.xlu1 %v369_v26  ;;  %352 = vadd.xlane.f32.xlu0 %v351_v27 }
 0x1a5   :  { %376 = vadd.xlane.f32.xlu1 %v375_v56 }
 0x212   :  { %v338_v41 = vpop.xlane.xlu0 %337  ;;  %v362_v39 = vpop.xlane.xlu1 %361 }
 0x213   :  { %v380_v42 = vmul.f32 0.015625, %v338_v41  ;;  %v388_v52 = vmul.f32 0.015625, %v362_v39 }
 0x215   :  { %v396_v43 = vadd.f32 1e-05, %v380_v42  ;;  %v404_v61 = vadd.f32 1e-05, %v388_v52 }
 0x216   :  { %v332_v47 = vpop.xlane.xlu0 %331 }
 0x217   :  { %v378_v50 = vmul.f32 0.015625, %v332_v47  ;;  %3265 = vrsqrt.f32 %v396_v43 }
 0x219   :  { %v394_v51 = vadd.f32 1e-05, %v378_v50 }
 0x21a   :  { %v365_v53 = vpop.xlane.xlu1 %364  ;;  %v356_v58 = vpop.xlane.xlu0 %355 }
 0x21b   :  { %3267 = vrsqrt.f32 %v394_v51  ;;  %v386_v60 = vmul.f32 0.015625, %v356_v58  ;;  %v389_v37 = vmul.f32 0.015625, %v365_v53 }
 0x21c   :  { %3269 = vrsqrt.f32 %v404_v61 }
 0x21d   :  { %v402_v49 = vadd.f32 1e-05, %v386_v60  ;;  %v405_v61 = vadd.f32 1e-05, %v389_v37 }
 0x21e   :  { %v335_v63 = vpop.xlane.xlu1 %334  ;;  %v341_v0 = vpop.xlane.xlu0 %340 }
 0x21f   :  { %v379_v1 = vmul.f32 0.015625, %v335_v63  ;;  %v381_v4 = vmul.f32 0.015625, %v341_v0 }
 0x221   :  { %v395_v7 = vadd.f32 1e-05, %v379_v1  ;;  %v397_v8 = vadd.f32 1e-05, %v381_v4  ;;  %v3266_v13 = vpop.eup %3265 }
 0x222   :  { %v359_v16 = vpop.xlane.xlu1 %358  ;;  %v350_v18 = vpop.xlane.xlu0 %349  ;;  %v428_v19 = vmul.f32 %v3266_v13, %v3593_v3 }
 0x223   :  { %3271 = vrsqrt.f32 %v395_v7  ;;  %v387_v20 = vmul.f32 0.015625, %v359_v16  ;;  %v384_v21 = vmul.f32 0.015625, %v350_v18 }
 0x224   :  { %3273 = vrsqrt.f32 %v397_v8  ;;  %v448_v23 = vmul.f32 %v3699_v5, %v428_v19 }
 0x225   :  { %v3268_v24 = vpop.eup %3267  ;;  %3275 = vrsqrt.f32 %v402_v49  ;;  %v403_v26 = vadd.f32 1e-05, %v387_v20  ;;  %v400_v27 = vadd.f32 1e-05, %v384_v21 }
 0x226   :  { %v426_v57 = vmul.f32 %v3268_v24, %v3603_v15  ;;  %v344_v56 = vpop.xlane.xlu0 %343  ;;  %v3710_v12 = vadd.f32 %v3704_v17, %v448_v23  ;;  %v374_v30 = vpop.xlane.xlu1 %373 }
 0x227   :  { %v382_v31 = vmul.f32 0.015625, %v344_v56  ;;  %3277 = vrsqrt.f32 %v400_v27  ;;  %v3270_v40 = vpop.eup %3269  ;;  %v392_v49 = vmul.f32 0.015625, %v374_v30 }
 0x228   :  { %v446_v3 = vmul.f32 %v3699_v5, %v426_v57  ;;  %v484_v32 = vmax.f32 %v3710_v12, 0.0  ;;  %3279 = vrsqrt.f32 %v403_v26  ;;  %v436_v53 = vmul.f32 %v3270_v40, %v3590_v2 }
 0x229   :  { %v398_v33 = vadd.f32 1e-05, %v382_v31  ;;  %v408_v27 = vadd.f32 1e-05, %v392_v49 }
 0x22a   :  { %v347_v34 = vpop.xlane.xlu0 %346  ;;  %v466_v36 = vadd.f32 %v3704_v17, %v446_v3  ;;  %v512_v15 = vsel %vm232_vm1, %v484_v32, -inf  ;;  %v368_v43 = vpop.xlane.xlu1 %367 }
 0x22b   :  { %3281 = vrsqrt.f32 %v398_v33  ;;  %v383_v41 = vmul.f32 0.015625, %v347_v34  ;;  %v513_v60 = vrot.slane %v512_v15, 4  ;;  %v390_v16 = vmul.f32 0.015625, %v368_v43 }
 0x22c   :  { %v482_v39 = vmax.f32 %v466_v36, 0.0 }
 0x22d   :  { %v3272_v42 = vpop.eup %3271  ;;  %v399_v51 = vadd.f32 1e-05, %v383_v41  ;;  %v406_v30 = vadd.f32 1e-05, %v390_v16 }
 0x22e   :  { %v3274_v47 = vpop.eup %3273  ;;  %v427_v50 = vmul.f32 %v3272_v42, %v3625_v29  ;;  %v353_v52 = vpop.xlane.xlu0 %352  ;;  %v498_v8 = vsel %vm232_vm1, %v482_v39, -inf }
 0x22f   :  { %v3276_v58 = vpop.eup %3275  ;;  %v429_v63 = vmul.f32 %v3274_v47, %v3615_v22  ;;  %v385_v0 = vmul.f32 0.015625, %v353_v52  ;;  %3283 = vrsqrt.f32 %v399_v51  ;;  %v514_v22 = vmax.f32 %v512_v15, %v513_v60  ;;  %v371_v21 = vpop.xlane.xlu1 %370 }
 0x230   :  { %v447_v1 = vmul.f32 %v3699_v5, %v427_v50  ;;  %v434_v13 = vmul.f32 %v3276_v58, %v3600_v14  ;;  %3285 = vrsqrt.f32 %v405_v61  ;;  %v499_v23 = vrot.slane %v498_v8, 4 }
 0x231   :  { %v449_v4 = vmul.f32 %v3699_v5, %v429_v63  ;;  %v401_v7 = vadd.f32 1e-05, %v385_v0  ;;  %v3278_v29 = vpop.eup %3277  ;;  %v456_v14 = vmul.f32 %v3699_v5, %v436_v53  ;;  %v515_v33 = vrot.slane %v514_v22, 2 }
 0x232   :  { %v467_v18 = vadd.f32 %v3704_v17, %v447_v1  ;;  %v3280_v19 = vpop.eup %3279  ;;  %v432_v20 = vmul.f32 %v3278_v29, %v3638_v46  ;;  %v454_v3 = vmul.f32 %v3699_v5, %v434_v13  ;;  %v391_v40 = vmul.f32 0.015625, %v371_v21 }
 0x233   :  { %v469_v2 = vadd.f32 %v3704_v17, %v449_v4  ;;  %3287 = vrsqrt.f32 %v401_v7  ;;  %v435_v12 = vmul.f32 %v3280_v19, %v3622_v35  ;;  %v500_v15 = vmax.f32 %v498_v8, %v499_v23  ;;  %v377_v42 = vpop.xlane.xlu1 %376 }
 0x234   :  { %v483_v24 = vmax.f32 %v467_v18, 0.0  ;;  %v452_v57 = vmul.f32 %v3699_v5, %v432_v20  ;;  %v3741_v60 = vadd.f32 %v3704_v17, %v456_v14  ;;  %3289 = vrsqrt.f32 %v408_v27 }
 0x235   :  { %v485_v26 = vmax.f32 %v469_v2, 0.0  ;;  %v3282_v56 = vpop.eup %3281  ;;  %v455_v58 = vmul.f32 %v3699_v5, %v435_v12  ;;  %v407_v63 = vadd.f32 1e-05, %v391_v40  ;;  %v393_v0 = vmul.f32 0.015625, %v377_v42 }
 0x236   :  { %v505_v31 = vsel %vm232_vm1, %v483_v24, -inf  ;;  %v430_v34 = vmul.f32 %v3282_v56, %v3649_v44  ;;  %v610_v41 = vpack.c.bf16 %v483_v24, %v482_v39  ;;  %v472_v50 = vadd.f32 %v3704_v17, %v452_v57 }
 0x237   :  { %v519_v46 = vsel %vm232_vm1, %v485_v26, -inf  ;;  %v506_v36 = vrot.slane %v505_v31, 4  ;;  %v611_v47 = vpack.c.bf16 %v485_v26, %v484_v32  ;;  %v3738_v44 = vadd.f32 %v3704_v17, %v454_v3 }
 0x238   :  { %v520_v37 = vrot.slane %v519_v46, 4  ;;  %v450_v35 = vmul.f32 %v3699_v5, %v430_v34  ;;  %3066 = vmatprep.mubr.msk.bf16.mxu1 %vm232_vm1, %v610_v41  ;;  %v516_v39 = vmax.f32 %v514_v22, %v515_v33  ;;  %v501_v53 = vrot.slane %v500_v15, 2 }
 0x239   :  { %v507_v43 = vmax.f32 %v505_v31, %v506_v36  ;;  %v3284_v51 = vpop.eup %3283  ;;  %3067 = vmatmul.mubr.msk.bf16.vlgmr.msra.gmra.mrb[8].mxu1 %vm232_vm1, %v611_v47  ;;  %3291 = vrsqrt.f32 %v406_v30  ;;  %v488_v7 = vmax.f32 %v472_v50, 0.0  ;;  %v475_v16 = vadd.f32 %v3704_v17, %v455_v58 }
 0x23a   :  { %v521_v52 = vmax.f32 %v519_v46, %v520_v37  ;;  %v431_v32 = vmul.f32 %v3284_v51, %v3662_v6  ;;  %v470_v61 = vadd.f32 %v3704_v17, %v450_v35  ;;  %v3286_v1 = vpop.eup %3285  ;;  %v490_v6 = vmax.f32 %v3738_v44, 0.0 }
 0x23b   :  { %v508_v4 = vrot.slane %v507_v43, 2  ;;  %v517_v18 = vrot.slane %v516_v39, 1  ;;  %v492_v2 = vmax.f32 %v3741_v60, 0.0  ;;  %v437_v20 = vmul.f32 %v3286_v1, %v3612_v25 }
 0x23c   :  { %v451_v49 = vmul.f32 %v3699_v5, %v431_v32  ;;  %v522_v29 = vrot.slane %v521_v52, 2  ;;  %v486_v13 = vmax.f32 %v470_v61, 0.0  ;;  %3293 = vrsqrt.f32 %v407_v63 }
 0x23d   :  { %v3288_v8 = vpop.eup %3287  ;;  %v409_v21 = vadd.f32 1e-05, %v393_v0  ;;  %v502_v24 = vmax.f32 %v500_v15, %v501_v53  ;;  %v509_v23 = vmax.f32 %v507_v43, %v508_v4  ;;  %v540_v57 = vsel %vm232_vm1, %v488_v7, -inf }
 0x23e   :  { %v433_v19 = vmul.f32 %v3288_v8, %v3673_v54  ;;  %v471_v22 = vadd.f32 %v3704_v17, %v451_v49  ;;  %v523_v14 = vmax.f32 %v521_v52, %v522_v29  ;;  %v526_v56 = vsel %vm232_vm1, %v486_v13, -inf  ;;  %v3290_v34 = vpop.eup %3289 }
 0x23f   :  { %v491_v12 = vmax.f32 %v475_v16, 0.0  ;;  %v554_v54 = vsel %vm232_vm1, %v490_v6, -inf  ;;  %v518_v30 = vmax.f32 %v516_v39, %v517_v18  ;;  %3295 = vrsqrt.f32 %v409_v21 }
 0x240   :  { %v487_v26 = vmax.f32 %v471_v22, 0.0  ;;  %v453_v27 = vmul.f32 %v3699_v5, %v433_v19  ;;  %v503_v33 = vrot.slane %v502_v24, 1  ;;  %v568_v46 = vsel %vm232_vm1, %v492_v2, -inf }
 0x241   :  { %v527_v36 = vrot.slane %v526_v56, 4  ;;  %v541_v40 = vrot.slane %v540_v57, 4  ;;  %v555_v15 = vrot.slane %v554_v54, 4  ;;  %v524_v41 = vrot.slane %v523_v14, 1 }
 0x242   :  { %v533_v31 = vsel %vm232_vm1, %v487_v26, -inf  ;;  %v612_v3 = vpack.c.bf16 %v487_v26, %v486_v13  ;;  %v473_v25 = vadd.f32 %v3704_v17, %v453_v27  ;;  %v510_v42 = vrot.slane %v509_v23, 1 }
 0x243   :  { %v534_v43 = vrot.slane %v533_v31, 4  ;;  %v561_v47 = vsel %vm232_vm1, %v491_v12, -inf  ;;  %v3292_v35 = vpop.eup %3291  ;;  %v773_v50 = vpack.c.bf16 %v518_v30, %v518_v30  ;;  %v457_v52 = vmul.f32 %v3699_v5, %v437_v20 }
 0x244   :  { %3070 = vmatprep.mubr.msk.bf16.mxu1 %vm232_vm1, %v612_v3  ;;  %v489_v37 = vmax.f32 %v473_v25, 0.0  ;;  %v440_v58 = vmul.f32 %v3290_v34, %v3635_v38  ;;  %v504_v44 = vmax.f32 %v502_v24, %v503_v33  ;;  %v556_v39 = vmax.f32 %v554_v54, %v555_v15 }
 0x245   :  { %v569_v32 = vrot.slane %v568_v46, 4  ;;  %v528_v61 = vmax.f32 %v526_v56, %v527_v36  ;;  %v542_v63 = vmax.f32 %v540_v57, %v541_v40  ;;  %v562_v53 = vrot.slane %v561_v47, 4 }
 0x246   :  { %v613_v51 = vpack.c.bf16 %v489_v37, %v488_v7  ;;  %v547_v0 = vsel %vm232_vm1, %v489_v37, -inf  ;;  %v3294_v1 = vpop.eup %3293  ;;  %v525_v4 = vmax.f32 %v523_v14, %v524_v41  ;;  %v511_v49 = vmax.f32 %v509_v23, %v510_v42 }
 0x247   :  { %v535_v8 = vmax.f32 %v533_v31, %v534_v43  ;;  %v614_v29 = vpack.c.bf16 %v491_v12, %v490_v6  ;;  %v3768_v7 = vunpack.c.l.b16 %v773_v50  ;;  %v438_v13 = vmul.f32 %v3292_v35, %v3646_v45 }
 0x248   :  { %3071 = vmatmul.mubr.msk.bf16.gmra.mrb[12].mxu1 %vm232_vm1, %v613_v51  ;;  %v563_v38 = vmax.f32 %v561_v47, %v562_v53  ;;  %v477_v16 = vadd.f32 %v3704_v17, %v457_v52  ;;  %v771_v18 = vpack.c.bf16 %v504_v44, %v504_v44  ;;  %v548_v19 = vrot.slane %v547_v0, 4 }
 0x249   :  { %v557_v22 = vrot.slane %v556_v39, 2  ;;  %3074 = vmatprep.mubr.msk.bf16.mxu1 %vm232_vm1, %v614_v29  ;;  %v570_v20 = vmax.f32 %v568_v46, %v569_v32  ;;  %v529_v21 = vrot.slane %v528_v61, 2  ;;  %v543_v24 = vrot.slane %v542_v63, 2  ;;  %v3296_v23 = vpop.eup %3295 }
 0x24a   :  { %v564_v26 = vrot.slane %v563_v38, 2  ;;  %v493_v27 = vmax.f32 %v477_v16, 0.0  ;;  %v774_v57 = vpack.c.bf16 %v525_v4, %v525_v4  ;;  %v439_v6 = vmul.f32 %v3294_v1, %v3659_v48 }
 0x24b   :  { %v772_v14 = vpack.c.bf16 %v511_v49, %v511_v49  ;;  %v536_v56 = vrot.slane %v535_v8, 2  ;;  %v571_v12 = vrot.slane %v570_v20, 2  ;;  %v458_v30 = vmul.f32 %v3699_v5, %v438_v13 }
 0x24c   :  { %v565_v45 = vmax.f32 %v563_v38, %v564_v26  ;;  %v575_v54 = vsel %vm232_vm1, %v493_v27, -inf  ;;  %v3776_v31 = vunpack.c.l.b16 %v771_v18  ;;  %v549_v3 = vmax.f32 %v547_v0, %v548_v19 }
 0x24d   :  { %v558_v25 = vmax.f32 %v556_v39, %v557_v22  ;;  %v576_v33 = vrot.slane %v575_v54, 4  ;;  %v441_v46 = vmul.f32 %v3296_v23, %v3670_v55  ;;  %v530_v34 = vmax.f32 %v528_v61, %v529_v21 }
 0x24e   :  { %v3779_v36 = vmax.f32 %v542_v63, %v543_v24  ;;  %v615_v48 = vpack.c.bf16 %v493_v27, %v492_v2  ;;  %v812_v37 = vunpack.c.l.b16 %v772_v14  ;;  %v566_v40 = vrot.slane %v565_v45, 1 }
 0x24f   :  { %v577_v15 = vmax.f32 %v575_v54, %v576_v33  ;;  %v459_v41 = vmul.f32 %v3699_v5, %v439_v6  ;;  %v3784_v42 = vunpack.c.l.b16 %v774_v57  ;;  %v537_v43 = vmax.f32 %v535_v8, %v536_v56 }
 0x250   :  { %v572_v47 = vmax.f32 %v570_v20, %v571_v12  ;;  %3075 = vmatmul.mubr.msk.bf16.gmra.mrb[16].mxu1 %vm232_vm1, %v615_v48  ;;  %v478_v35 = vadd.f32 %v3704_v17, %v458_v30  ;;  %v550_v55 = vrot.slane %v549_v3, 2  ;;  %v559_v50 = vrot.slane %v558_v25, 1 }
 0x251   :  { %v578_v51 = vrot.slane %v577_v15, 2  ;;  %v479_v60 = vadd.f32 %v3704_v17, %v459_v41  ;;  %v531_v2 = vrot.slane %v530_v34, 1  ;;  %v545_v52 = vrot.slane %v3779_v36, 1 }
 0x252   :  { %v494_v44 = vmax.f32 %v478_v35, 0.0  ;;  %v460_v39 = vmul.f32 %v3699_v5, %v440_v58  ;;  %v567_v32 = vmax.f32 %v565_v45, %v566_v40  ;;  %v461_v0 = vmul.f32 %v3699_v5, %v441_v46 }
 0x253   :  { %v579_v61 = vmax.f32 %v577_v15, %v578_v51  ;;  %v495_v63 = vmax.f32 %v479_v60, 0.0  ;;  %v538_v53 = vrot.slane %v537_v43, 1  ;;  %v573_v1 = vrot.slane %v572_v47, 1 }
 0x254   :  { %v582_v4 = vsel %vm232_vm1, %v494_v44, -inf  ;;  %v480_v49 = vadd.f32 %v3704_v17, %v460_v39  ;;  %v551_v8 = vmax.f32 %v549_v3, %v550_v55  ;;  %v560_v29 = vmax.f32 %v558_v25, %v559_v50 }
 0x255   :  { %v583_v13 = vrot.slane %v582_v4, 4  ;;  %v589_v38 = vsel %vm232_vm1, %v495_v63, -inf  ;;  %v532_v16 = vmax.f32 %v530_v34, %v531_v2  ;;  %v616_v58 = vpack.c.bf16 %v495_v63, %v494_v44 }
 0x256   :  { %v590_v18 = vrot.slane %v589_v38, 4  ;;  %v481_v19 = vadd.f32 %v3704_v17, %v461_v0  ;;  %v780_v22 = vpack.c.bf16 %v567_v32, %v567_v32  ;;  %v580_v20 = vrot.slane %v579_v61, 1 }
 0x257   :  { %v584_v5 = vmax.f32 %v582_v4, %v583_v13  ;;  %v496_v21 = vmax.f32 %v480_v49, 0.0  ;;  %v539_v24 = vmax.f32 %v537_v43, %v538_v53  ;;  %v574_v26 = vmax.f32 %v572_v47, %v573_v1  ;;  %3078 = vmatprep.mubr.msk.bf16.mxu1 %vm232_vm1, %v616_v58 }
 0x258   :  { %v591_v27 = vmax.f32 %v589_v38, %v590_v18  ;;  %v497_v23 = vmax.f32 %v481_v19, 0.0  ;;  %v552_v57 = vrot.slane %v551_v8, 1  ;;  %v779_v6 = vpack.c.bf16 %v560_v29, %v560_v29 }
 0x259   :  { %v585_v14 = vrot.slane %v584_v5, 2  ;;  %v596_v56 = vsel %vm232_vm1, %v496_v21, -inf  ;;  %v820_v30 = vunpack.c.l.b16 %v780_v22  ;;  %v581_v3 = vmax.f32 %v579_v61, %v580_v20 }
 0x25a   :  { %v592_v45 = vrot.slane %v591_v27, 2  ;;  %v597_v12 = vrot.slane %v596_v56, 4  ;;  %v603_v17 = vsel %vm232_vm1, %v497_v23, -inf  ;;  %v617_v54 = vpack.c.bf16 %v497_v23, %v496_v21 }
 0x25b   :  { %v586_v25 = vmax.f32 %v584_v5, %v585_v14  ;;  %v604_v33 = vrot.slane %v603_v17, 4  ;;  %v828_v46 = vsel %vm827_vm3, %v812_v37, %v3776_v31  ;;  %v781_v34 = vpack.c.bf16 %v574_v26, %v574_v26 }
 0x25c   :  { %v593_v48 = vmax.f32 %v591_v27, %v592_v45  ;;  %v598_v40 = vmax.f32 %v596_v56, %v597_v12  ;;  %3079 = vmatmul.mubr.msk.bf16.gmra.mrb[20].mxu1 %vm232_vm1, %v617_v54  ;;  %v775_v15 = vpack.c.bf16 %v532_v16, %v532_v16  ;;  %v819_v41 = vunpack.c.l.b16 %v779_v6 }
 0x25d   :  { %v587_v43 = vrot.slane %v586_v25, 1  ;;  %v605_v47 = vmax.f32 %v603_v17, %v604_v33  ;;  %3110 = vmatprep.mubr.msk.bf16.mxu1 %vm3429_vm2, %v3428_v28  ;;  %v776_v35 = vpack.c.bf16 %v539_v24, %v539_v24  ;;  %v553_v55 = vmax.f32 %v551_v8, %v552_v57 }
 0x25e   :  { %v594_v50 = vrot.slane %v593_v48, 1  ;;  %v599_v51 = vrot.slane %v598_v40, 2  ;;  %v841_v60 = vsel %vm827_vm3, %v820_v30, %v819_v41  ;;  %v782_v2 = vpack.c.bf16 %v581_v3, %v581_v3 }
 0x25f   :  { %v588_v31 = vmax.f32 %v586_v25, %v587_v43  ;;  %v606_v37 = vrot.slane %v605_v47, 2  ;;  %v546_v44 = vmax.f32 %v3779_v36, %v545_v52  ;;  %v821_v39 = vunpack.c.l.b16 %v781_v34 }
 0x260   :  { %v595_v32 = vmax.f32 %v593_v48, %v594_v50  ;;  %v600_v61 = vmax.f32 %v598_v40, %v599_v51  ;;  %v830_v63 = vsel %vm829_vm4, %v3768_v7, %v828_v46  ;;  %v815_v0 = vunpack.c.l.b16 %v775_v15 }
 0x261   :  { %v783_v53 = vpack.c.bf16 %v588_v31, %v588_v31  ;;  %v607_v1 = vmax.f32 %v605_v47, %v606_v37  ;;  %v816_v4 = vunpack.c.l.b16 %v776_v35  ;;  %v842_v49 = vsel %vm829_vm4, %v821_v39, %v841_v60 }
 0x262   :  { %v784_v8 = vpack.c.bf16 %v595_v32, %v595_v32  ;;  %v601_v29 = vrot.slane %v600_v61, 1  ;;  %v778_v13 = vpack.c.bf16 %v553_v55, %v553_v55  ;;  %v822_v38 = vunpack.c.l.b16 %v782_v2 }
 0x263   :  { %v823_v16 = vunpack.c.l.b16 %v783_v53  ;;  %v608_v18 = vrot.slane %v607_v1, 1  ;;  %v777_v36 = vpack.c.bf16 %v546_v44, %v546_v44  ;;  %v832_v19 = vsel %vm831_vm5, %v3784_v42, %v830_v63 }
 0x264   :  { %v824_v52 = vunpack.c.l.b16 %v784_v8  ;;  %v602_v58 = vmax.f32 %v600_v61, %v601_v29  ;;  %v843_v7 = vsel %vm831_vm5, %v822_v38, %v842_v49  ;;  %v834_v20 = vsel %vm833_vm6, %v815_v0, %v832_v19 }
 0x265   :  { %v609_v22 = vmax.f32 %v607_v1, %v608_v18  ;;  %v844_v5 = vsel %vm833_vm6, %v823_v16, %v843_v7  ;;  %v836_v24 = vsel %vm835_vm7, %v816_v4, %v834_v20  ;;  %v818_v26 = vunpack.c.l.b16 %v778_v13  ;;  %v3852_v16 = vld [vmem:[%s4275_s3] sm:$0xff] }
 0x266   :  { %v785_v21 = vpack.c.bf16 %v602_v58, %v602_v58  ;;  %v845_v27 = vsel %vm835_vm7, %v824_v52, %v844_v5  ;;  %v817_v57 = vunpack.c.l.b16 %v777_v36  ;;  %v3430_v51 = vmov 1966171168  }
 0x267   :  { %v786_v23 = vpack.c.bf16 %v609_v22, %v609_v22  ;;  %v921_v60 = vunpack.c.l.s4 %v3430_v51  ;;  %v1115_v61 = vsub.s32 3, %v3513_v10 }
 0x268   :  { %v825_v6 = vunpack.c.l.b16 %v785_v21  ;;  %v838_v42 = vsel %vm837_vm8, %v817_v57, %v836_v24 }
 0x269   :  { %v826_v14 = vunpack.c.l.b16 %v786_v23  ;;  %v840_v45 = vsel %vm839_vm9, %v818_v26, %v838_v42  ;;  %v922_v2 = vunpack.c.0.s8 %v921_v60  ;;  %v3857_v18 = vrot.slane %v3852_v16, %v1115_v61 }
 0x26a   :  { %v846_v56 = vsel %vm837_vm8, %v825_v6, %v845_v27 }
 0x26b   :  { %v847_v12 = vsel %vm839_vm9, %v826_v14, %v846_v56  ;;  %v3840_v31 = vsub.s32 %v922_v2, %v3513_v10 }
 0x26c   :  { %v848_v17 = vpack.c.b16 %v847_v12, %v840_v45 }
 0x26e   :  { %3091 = vmatmul.mubr.msk.bf16.vlgmr.msra.gmra.mrb[8].mxu0 %vm232_vm1, %v848_v17 }
 0x26f   :  { %3130 = vmatprep.mubr.msk.bf16.mxu0 %vm3429_vm2, %v3428_v28 }
 0x30c   :  { %v3068_v54 = vpop.f32.mrb[8].mxu1 }
 0x30d   :  { %v708_v30 = vpop.f32.mrb[9].mxu1 }
 0x30e   :  { %v3823_v3 = vpop.f32.mrb[10].mxu1 }
 0x30f   :  { %v711_v25 = vpop.f32.mrb[11].mxu1 }
 0x31b   :  { %v3825_v33 = vpop.f32.mrb[12].mxu1 }
 0x31c   :  { %v724_v46 = vpop.f32.mrb[13].mxu1 }
 0x31d   :  { %v3827_v34 = vpop.f32.mrb[14].mxu1 }
 0x31e   :  { %v3829_v48 = vpop.f32.mrb[15].mxu1 }
 0x323   :  { %v3076_v40 = vpop.f32.mrb[16].mxu1 }
 0x324   :  { %v740_v15 = vpop.f32.mrb[17].mxu1 }
 0x325   :  { %v3831_v41 = vpop.f32.mrb[18].mxu1 }
 0x326   :  { %v743_v43 = vpop.f32.mrb[19].mxu1 }
 0x32f   :  { %v3833_v47 = vpop.f32.mrb[20].mxu1 }
 0x330   :  { %v756_v35 = vpop.f32.mrb[21].mxu1 }
 0x331   :  { %v3835_v55 = vpop.f32.mrb[22].mxu1 }
 0x332   :  { %v3837_v50 = vpop.f32.mrb[23].mxu1 }
 0x341   :  { %v910_v37 = vpop.f32.mrb[8].mxu0 }
 0x342   :  { %v919_v44 = vcombine.high %v910_v37, %v910_v37  ;;  %v926_v39 = vrot.slane %v910_v37, %v3840_v31  ;;  %v3092_v32 = vpop.f32.mrb[9].mxu0 }
 0x343   :  { %v913_v63 = vpop.f32.mrb[10].mxu0 }
 0x344   :  { %v933_v0 = vrot.slane %v919_v44, %v3840_v31  ;;  %v934_v53 = vcombine.high %v926_v39, %v926_v39  ;;  %v942_v1 = vrot.slane %v926_v39, %v3840_v31  ;;  %v968_v4 = vcombine.high %v913_v63, %v913_v63  ;;  %v3093_v49 = vpop.f32.mrb[11].mxu0 }
 0x345   :  { %v975_v8 = vrot.slane %v913_v63, %v3840_v31 }
 0x346   :  { %v949_v29 = vrot.slane %v933_v0, %v3840_v31  ;;  %v956_v13 = vrot.slane %v934_v53, %v3840_v31  ;;  %v964_v38 = vcombine.high %v942_v1, %v942_v1  ;;  %v982_v36 = vrot.slane %v968_v4, %v3840_v31 }
 0x347   :  { %v983_v52 = vcombine.high %v975_v8, %v975_v8  ;;  %v991_v58 = vrot.slane %v975_v8, %v3840_v31  ;;  %v1020_v19 = vrot.slane %v942_v1, %v3516_v11  ;;  %v935_v7 = vcombine.high %v933_v0, %v933_v0 }
 0x348   :  { %v1024_v22 = vrot.slane %v956_v13, %v3516_v11  ;;  %v1028_v20 = vrot.slane %v964_v38, %v3516_v11  ;;  %v1036_v5 = vrot.slane %v949_v29, %v3516_v11  ;;  %v998_v21 = vrot.slane %v982_v36, %v3840_v31 }
 0x349   :  { %v1005_v24 = vrot.slane %v983_v52, %v3840_v31  ;;  %v1013_v26 = vcombine.high %v991_v58, %v991_v58  ;;  %v966_v27 = vcombine.high %v956_v13, %v956_v13  ;;  %v1097_v23 = vadd.f32 %v1020_v19, %v708_v30 }
 0x34a   :  { %v1098_v57 = vadd.f32 %v1024_v22, %v711_v25  ;;  %v1052_v6 = vrot.slane %v991_v58, %v3516_v11  ;;  %v1099_v14 = vadd.f32 %v3068_v54, %v1028_v20  ;;  %v1101_v45 = vadd.f32 %v1036_v5, %v724_v46 }
 0x34b   :  { %v1056_v42 = vrot.slane %v1005_v24, %v3516_v11  ;;  %v1060_v56 = vrot.slane %v1013_v26, %v3516_v11  ;;  %v1068_v12 = vrot.slane %v998_v21, %v3516_v11  ;;  %v984_v17 = vcombine.high %v982_v36, %v982_v36 }
 0x34c   :  { %v3872_v51 = vadd.f32 %v3857_v18, %v1097_v23  ;;  %v3875_v60 = vadd.f32 %v3857_v18, %v1098_v57  ;;  %v1105_v2 = vadd.f32 %v1052_v6, %v740_v15  ;;  %v1032_v54 = vrot.slane %v966_v27, %v3516_v11 }
 0x34d   :  { %v1106_v30 = vadd.f32 %v1056_v42, %v743_v43  ;;  %v1107_v25 = vadd.f32 %v3076_v40, %v1060_v56  ;;  %v1109_v37 = vadd.f32 %v1068_v12, %v756_v35  ;;  %v1015_v46 = vcombine.high %v1005_v24, %v1005_v24 }
 0x34e   :  { %1133 = vadd.xlane.f32.xlu0 %v3872_v51  ;;  %1135 = vadd.xlane.f32.xlu1 %v3875_v60  ;;  %v1125_v44 = vadd.f32 %v3857_v18, %v1105_v2  ;;  %v963_v32 = vrot.slane %v935_v7, %v3840_v31  ;;  %v1100_v63 = vadd.f32 %v3823_v3, %v1032_v54 }
 0x34f   :  { %v1126_v39 = vadd.f32 %v3857_v18, %v1106_v30  ;;  %v1064_v15 = vrot.slane %v1015_v46, %v3516_v11  ;;  %v1012_v40 = vrot.slane %v984_v17, %v3840_v31  ;;  %v965_v43 = vcombine.high %v949_v29, %v949_v29 }
 0x350   :  { %v1040_v35 = vrot.slane %v963_v32, %v3516_v11  ;;  %v1014_v0 = vcombine.high %v998_v21, %v998_v21  ;;  %v967_v53 = vcombine.high %v963_v32, %v963_v32  ;;  %v1119_v29 = vadd.f32 %v3857_v18, %v1099_v14 }
 0x351   :  { %v1108_v1 = vadd.f32 %v3831_v41, %v1064_v15  ;;  %v1072_v4 = vrot.slane %v1012_v40, %v3516_v11  ;;  %v1044_v8 = vrot.slane %v965_v43, %v3516_v11  ;;  %v1127_v38 = vadd.f32 %v3857_v18, %v1107_v25 }
 0x352   :  { %1149 = vadd.xlane.f32.xlu0 %v1125_v44  ;;  %1151 = vadd.xlane.f32.xlu1 %v1126_v39  ;;  %v1102_v49 = vadd.f32 %v1040_v35, %v3829_v48  ;;  %v1076_v3 = vrot.slane %v1014_v0, %v3516_v11  ;;  %v1048_v13 = vrot.slane %v967_v53, %v3516_v11 }
 0x353   :  { %v1110_v36 = vadd.f32 %v1072_v4, %v3837_v50  ;;  %v1016_v52 = vcombine.high %v1012_v40, %v1012_v40  ;;  %v1103_v58 = vadd.f32 %v3825_v33, %v1044_v8  ;;  %v1121_v7 = vadd.f32 %v3857_v18, %v1101_v45 }
 0x354   :  { %v1111_v41 = vadd.f32 %v3833_v47, %v1076_v3  ;;  %v1104_v19 = vadd.f32 %v3827_v34, %v1048_v13  ;;  %v1129_v22 = vadd.f32 %v3857_v18, %v1109_v37  ;;  %v1120_v50 = vadd.f32 %v3857_v18, %v1100_v63 }
 0x355   :  { %v1080_v48 = vrot.slane %v1016_v52, %v3516_v11  ;;  %v1128_v33 = vadd.f32 %v3857_v18, %v1108_v1  ;;  %v3906_v34 = vadd.f32 %v3857_v18, %v1102_v49  ;;  %v3909_v47 = vadd.f32 %v3857_v18, %v1110_v36 }
 0x356   :  { %1137 = vadd.xlane.f32.xlu0 %v1119_v29  ;;  %1153 = vadd.xlane.f32.xlu1 %v1127_v38  ;;  %v3917_v5 = vadd.f32 %v3857_v18, %v1111_v41  ;;  %v3922_v21 = vadd.f32 %v3857_v18, %v1104_v19 }
 0x357   :  { %v1112_v20 = vadd.f32 %v3835_v55, %v1080_v48  ;;  %v3914_v55 = vadd.f32 %v3857_v18, %v1103_v58 }
 0x359   :  { %v3925_v24 = vadd.f32 %v3857_v18, %v1112_v20 }
 0x35a   :  { %1141 = vadd.xlane.f32.xlu0 %v1121_v7  ;;  %1157 = vadd.xlane.f32.xlu1 %v1129_v22 }
 0x35e   :  { %1139 = vadd.xlane.f32.xlu0 %v1120_v50  ;;  %1155 = vadd.xlane.f32.xlu1 %v1128_v33 }
 0x362   :  { %1143 = vadd.xlane.f32.xlu0 %v3906_v34  ;;  %1159 = vadd.xlane.f32.xlu1 %v3909_v47 }
 0x366   :  { %1145 = vadd.xlane.f32.xlu0 %v3914_v55  ;;  %1161 = vadd.xlane.f32.xlu1 %v3917_v5 }
 0x36a   :  { %1147 = vadd.xlane.f32.xlu0 %v3922_v21  ;;  %1163 = vadd.xlane.f32.xlu1 %v3925_v24 }
 0x3db   :  { %v1134_v26 = vpop.xlane.xlu0 %1133  ;;  %v1136_v27 = vpop.xlane.xlu1 %1135 }
 0x3dc   :  { %v1166_v23 = vmul.f32 0.0078125, %v1134_v26  ;;  %v1167_v57 = vmul.f32 0.0078125, %v1136_v27 }
 0x3de   :  { %v3930_v6 = vsub.f32 %v3872_v51, %v1166_v23  ;;  %v3933_v14 = vsub.f32 %v3875_v60, %v1167_v57 }
 0x3df   :  { %v1150_v42 = vpop.xlane.xlu0 %1149  ;;  %v1152_v56 = vpop.xlane.xlu1 %1151 }
 0x3e0   :  { %v1174_v45 = vmul.f32 0.0078125, %v1150_v42  ;;  %v1175_v12 = vmul.f32 0.0078125, %v1152_v56  ;;  %v1198_v18 = vmul.f32 %v3930_v6, %v3930_v6  ;;  %v1199_v17 = vmul.f32 %v3933_v14, %v3933_v14 }
 0x3e2   :  { %v3939_v2 = vsub.f32 %v1125_v44, %v1174_v45  ;;  %v3941_v30 = vsub.f32 %v1126_v39, %v1175_v12  ;;  %1214 = vadd.xlane.f32.xlu0 %v1198_v18  ;;  %1216 = vadd.xlane.f32.xlu1 %v1199_v17 }
 0x3e3   :  { %v1138_v51 = vpop.xlane.xlu0 %1137  ;;  %v1154_v25 = vpop.xlane.xlu1 %1153 }
 0x3e4   :  { %v1168_v60 = vmul.f32 0.0078125, %v1138_v51  ;;  %v1176_v37 = vmul.f32 0.0078125, %v1154_v25  ;;  %v1206_v54 = vmul.f32 %v3939_v2, %v3939_v2  ;;  %v1207_v46 = vmul.f32 %v3941_v30, %v3941_v30  ;;  %v3177_v25 = vld [vmem:[#allocation2 + $0x54] ss:$8 sps:$4 sm:$0xff]  }
 0x3e5   :  { %3115 = vmatpush3.bf16.msra.mxu0 %v3177_v25 }
 0x3e6   :  { %v3947_v32 = vsub.f32 %v1119_v29, %v1168_v60  ;;  %v3949_v63 = vsub.f32 %v1127_v38, %v1176_v37  ;;  %1230 = vadd.xlane.f32.xlu0 %v1206_v54  ;;  %1232 = vadd.xlane.f32.xlu1 %v1207_v46  ;;  %v3178_v60 = vld [vmem:[#allocation2 + $0x64] ss:$8 sps:$4 sm:$0xff]   ;;  %v3181_v37 = vld [vmem:[#allocation2 + $0x94] ss:$8 sps:$4 sm:$0xff]  }
 0x3e7   :  { %v1142_v44 = vpop.xlane.xlu0 %1141  ;;  %v1158_v39 = vpop.xlane.xlu1 %1157  ;;  %3116 = vmatprep.subr.bf16.mxu0 %v3428_v28  ;;  %v3182_v54 = vld [vmem:[#allocation2 + $0xa4] ss:$8 sps:$4 sm:$0xff]   ;;  %v3183_v46 = vld [vmem:[#allocation2 + $0xb4] ss:$8 sps:$4 sm:$0xff]  }
 0x3e8   :  { %v1170_v15 = vmul.f32 0.0078125, %v1142_v44  ;;  %v1178_v40 = vmul.f32 0.0078125, %v1158_v39  ;;  %v1200_v43 = vmul.f32 %v3947_v32, %v3947_v32  ;;  %v1208_v35 = vmul.f32 %v3949_v63, %v3949_v63  ;;  %v3184_v44 = vld [vmem:[#allocation2 + $0x50] ss:$8 sps:$4 sm:$0xff]   ;;  %v3185_v39 = vld [vmem:[#allocation2 + $0xc4] ss:$8 sps:$4 sm:$0xff]  }
 0x3e9   :  { %3117 = vmatpush3.bf16.msra.mxu0 %v3178_v60  ;;  %3095 = vmatpush3.bf16.msra.mxu1 %v3184_v44  ;;  %v4017_v44 = vsub.s32 4, %v3513_v10 }
 0x3ea   :  { %v3955_v0 = vsub.f32 %v1121_v7, %v1170_v15  ;;  %v3957_v53 = vsub.f32 %v1129_v22, %v1178_v40  ;;  %1218 = vadd.xlane.f32.xlu0 %v1200_v43  ;;  %1234 = vadd.xlane.f32.xlu1 %v1208_v35  ;;  %v3186_v15 = vld [vmem:[#allocation2 + $0x60] ss:$8 sps:$4 sm:$0xff]   ;;  %v3187_v40 = vld [vmem:[#allocation2 + $0x70] ss:$8 sps:$4 sm:$0xff]  }
 0x3eb   :  { %v1140_v1 = vpop.xlane.xlu0 %1139  ;;  %v1156_v4 = vpop.xlane.xlu1 %1155  ;;  %3118 = vmatprep.subr.bf16.mxu0 %v3428_v28  ;;  %3096 = vmatprep.subr.bf16.mxu1 %v3428_v28  ;;  %v3188_v43 = vld [vmem:[#allocation2 + $0x80] ss:$8 sps:$4 sm:$0xff]   ;;  %v3189_v35 = vld [vmem:[#allocation2 + $0x90] ss:$8 sps:$4 sm:$0xff]  }
 0x3ec   :  { %v1169_v49 = vmul.f32 0.0078125, %v1140_v1  ;;  %v1177_v8 = vmul.f32 0.0078125, %v1156_v4  ;;  %v1202_v3 = vmul.f32 %v3955_v0, %v3955_v0  ;;  %v1210_v13 = vmul.f32 %v3957_v53, %v3957_v53  ;;  %v3190_v1 = vld [vmem:[#allocation2 + $0xa0] ss:$8 sps:$4 sm:$0xff]   ;;  %v3191_v4 = vld [vmem:[#allocation2 + $0xb0] ss:$8 sps:$4 sm:$0xff]  }
 0x3ed   :  { %3097 = vmatpush3.bf16.msra.mxu1 %v3186_v15 }
 0x3ee   :  { %v3963_v29 = vsub.f32 %v1120_v50, %v1169_v49  ;;  %v3965_v38 = vsub.f32 %v1128_v33, %v1177_v8  ;;  %1222 = vadd.xlane.f32.xlu0 %v1202_v3  ;;  %1238 = vadd.xlane.f32.xlu1 %v1210_v13  ;;  %v3192_v49 = vld [vmem:[#allocation2 + $0xc0] ss:$8 sps:$4 sm:$0xff]  }
 0x3ef   :  { %v1144_v36 = vpop.xlane.xlu0 %1143  ;;  %v1160_v52 = vpop.xlane.xlu1 %1159  ;;  %3098 = vmatprep.subr.bf16.mxu1 %v3428_v28 }
 0x3f0   :  { %v1171_v58 = vmul.f32 0.0078125, %v1144_v36  ;;  %v1179_v41 = vmul.f32 0.0078125, %v1160_v52  ;;  %v1201_v19 = vmul.f32 %v3963_v29, %v3963_v29  ;;  %v1209_v48 = vmul.f32 %v3965_v38, %v3965_v38 }
 0x3f1   :  { %3099 = vmatpush3.bf16.msra.mxu1 %v3187_v40 }
 0x3f2   :  { %v3972_v7 = vsub.f32 %v3906_v34, %v1171_v58  ;;  %v3975_v22 = vsub.f32 %v3909_v47, %v1179_v41  ;;  %1220 = vadd.xlane.f32.xlu0 %v1201_v19  ;;  %1236 = vadd.xlane.f32.xlu1 %v1209_v48 }
 0x3f3   :  { %v1146_v20 = vpop.xlane.xlu0 %1145  ;;  %v1162_v50 = vpop.xlane.xlu1 %1161  ;;  %3100 = vmatprep.subr.bf16.mxu1 %v3428_v28 }
 0x3f4   :  { %v1172_v33 = vmul.f32 0.0078125, %v1146_v20  ;;  %v1180_v26 = vmul.f32 0.0078125, %v1162_v50  ;;  %v1203_v27 = vmul.f32 %v3972_v7, %v3972_v7  ;;  %v1211_v23 = vmul.f32 %v3975_v22, %v3975_v22 }
 0x3f5   :  { %3101 = vmatpush3.bf16.msra.mxu1 %v3188_v43 }
 0x3f6   :  { %v3982_v57 = vsub.f32 %v3914_v55, %v1172_v33  ;;  %v3985_v34 = vsub.f32 %v3917_v5, %v1180_v26  ;;  %1224 = vadd.xlane.f32.xlu0 %v1203_v27  ;;  %1240 = vadd.xlane.f32.xlu1 %v1211_v23 }
 0x3f7   :  { %v1148_v47 = vpop.xlane.xlu0 %1147  ;;  %v1164_v42 = vpop.xlane.xlu1 %1163  ;;  %3102 = vmatprep.subr.bf16.mxu1 %v3428_v28 }
 0x3f8   :  { %v1173_v56 = vmul.f32 0.0078125, %v1148_v47  ;;  %v1181_v45 = vmul.f32 0.0078125, %v1164_v42  ;;  %v1204_v12 = vmul.f32 %v3982_v57, %v3982_v57  ;;  %v1212_v18 = vmul.f32 %v3985_v34, %v3985_v34 }
 0x3f9   :  { %3103 = vmatpush3.bf16.msra.mxu1 %v3189_v35 }
 0x3fa   :  { %v3992_v17 = vsub.f32 %v3922_v21, %v1173_v56  ;;  %v3995_v55 = vsub.f32 %v3925_v24, %v1181_v45  ;;  %1226 = vadd.xlane.f32.xlu0 %v1204_v12  ;;  %1242 = vadd.xlane.f32.xlu1 %v1212_v18  ;;  %v3179_v21 = vld [vmem:[#allocation2 + $0x74] ss:$8 sps:$4 sm:$0xff]   ;;  %v3180_v24 = vld [vmem:[#allocation2 + $0x84] ss:$8 sps:$4 sm:$0xff]  }
 0x3fb   :  { %3119 = vmatpush3.bf16.msra.mxu0 %v3179_v21  ;;  %3104 = vmatprep.subr.bf16.mxu1 %v3428_v28 }
 0x3fc   :  { %v1205_v5 = vmul.f32 %v3992_v17, %v3992_v17  ;;  %v1213_v51 = vmul.f32 %v3995_v55, %v3995_v55  ;;  %3120 = vmatprep.subr.bf16.mxu0 %v3428_v28 }
 0x3fd   :  { %3105 = vmatpush3.bf16.msra.mxu1 %v3190_v1 }
 0x3fe   :  { %1228 = vadd.xlane.f32.xlu0 %v1205_v5  ;;  %1244 = vadd.xlane.f32.xlu1 %v1213_v51 }
 0x3ff   :  { %3121 = vmatpush3.bf16.msra.mxu0 %v3180_v24  ;;  %3106 = vmatprep.subr.bf16.mxu1 %v3428_v28 }
 0x400   :  { %3122 = vmatprep.subr.bf16.mxu0 %v3428_v28 }
 0x401   :  { %3107 = vmatpush3.bf16.msra.mxu1 %v3191_v4 }
 0x402   :  { %3108 = vmatprep.subr.bf16.mxu1 %v3428_v28 }
 0x403   :  { %3123 = vmatpush3.bf16.msra.mxu0 %v3181_v37 }
 0x404   :  { %3124 = vmatprep.subr.bf16.mxu0 %v3428_v28 }
 0x405   :  { %3109 = vmatpush3.bf16.msra.mxu1 %v3192_v49 }
 0x406   :  { %3134 = vmatprep.subr.bf16.mxu1 %v3428_v28 }
 0x407   :  { %3125 = vmatpush3.bf16.msra.mxu0 %v3182_v54 }
 0x408   :  { %3126 = vmatprep.subr.bf16.mxu0 %v3428_v28 }
 0x40b   :  { %3127 = vmatpush3.bf16.msra.mxu0 %v3183_v46 }
 0x40c   :  { %3128 = vmatprep.subr.bf16.mxu0 %v3428_v28 }
 0x40f   :  { %3129 = vmatpush3.bf16.msra.mxu0 %v3185_v39 }
 0x46f   :  { %v1215_v8 = vpop.xlane.xlu0 %1214  ;;  %v1217_v3 = vpop.xlane.xlu1 %1216 }
 0x470   :  { %v1247_v13 = vmul.f32 0.0078125, %v1217_v3  ;;  %v1246_v20 = vmul.f32 0.0078125, %v1215_v8  ;;  %v4022_v3 = vrot.slane %v3852_v16, %v4017_v44 }
 0x472   :  { %v1263_v58 = vadd.f32 1e-05, %v1247_v13  ;;  %v1262_v42 = vadd.f32 1e-05, %v1246_v20  ;;  %v4025_v13 = vsub.s32 5, %v3513_v10 }
 0x473   :  { %v1231_v36 = vpop.xlane.xlu0 %1230  ;;  %v1233_v52 = vpop.xlane.xlu1 %1232 }
 0x474   :  { %3297 = vrsqrt.f32 %v1263_v58  ;;  %v1255_v48 = vmul.f32 0.0078125, %v1233_v52  ;;  %v1254_v23 = vmul.f32 0.0078125, %v1231_v36 }
 0x476   :  { %v1271_v47 = vadd.f32 1e-05, %v1255_v48  ;;  %v1270_v25 = vadd.f32 1e-05, %v1254_v23  ;;  %v4030_v48 = vrot.slane %v3852_v16, %v4025_v13 }
 0x477   :  { %v1219_v41 = vpop.xlane.xlu0 %1218  ;;  %v1235_v19 = vpop.xlane.xlu1 %1234 }
 0x478   :  { %v1248_v50 = vmul.f32 0.0078125, %v1219_v41  ;;  %v1256_v27 = vmul.f32 0.0078125, %v1235_v19  ;;  %3299 = vrsqrt.f32 %v1271_v47 }
 0x479   :  { %3301 = vrsqrt.f32 %v1262_v42 }
 0x47a   :  { %v1264_v56 = vadd.f32 1e-05, %v1248_v50  ;;  %v1272_v18 = vadd.f32 1e-05, %v1256_v27 }
 0x47b   :  { %v1223_v33 = vpop.xlane.xlu0 %1222  ;;  %v1239_v26 = vpop.xlane.xlu1 %1238 }
 0x47c   :  { %v1250_v60 = vmul.f32 0.0078125, %v1223_v33  ;;  %v1258_v21 = vmul.f32 0.0078125, %v1239_v26  ;;  %3303 = vrsqrt.f32 %v1264_v56 }
 0x47d   :  { %3305 = vrsqrt.f32 %v1272_v18 }
 0x47e   :  { %v3298_v24 = vpop.eup %3297  ;;  %3307 = vrsqrt.f32 %v1270_v25  ;;  %v1266_v40 = vadd.f32 1e-05, %v1250_v60  ;;  %v1274_v1 = vadd.f32 1e-05, %v1258_v21 }
 0x47f   :  { %v1221_v45 = vpop.xlane.xlu0 %1220  ;;  %v1237_v12 = vpop.xlane.xlu1 %1236  ;;  %v1295_v35 = vmul.f32 %v3298_v24, %v3933_v14 }
 0x480   :  { %v1249_v5 = vmul.f32 0.0078125, %v1221_v45  ;;  %v1257_v51 = vmul.f32 0.0078125, %v1237_v12 }
 0x481   :  { %v1315_v58 = vmul.f32 %v4022_v3, %v1295_v35 }
 0x482   :  { %v1265_v37 = vadd.f32 1e-05, %v1249_v5  ;;  %v1273_v39 = vadd.f32 1e-05, %v1257_v51  ;;  %v3300_v41 = vpop.eup %3299 }
 0x483   :  { %v1225_v54 = vpop.xlane.xlu0 %1224  ;;  %v1241_v46 = vpop.xlane.xlu1 %1240  ;;  %v1335_v27 = vadd.f32 %v4030_v48, %v1315_v58  ;;  %v1303_v23 = vmul.f32 %v3300_v41, %v3941_v30 }
 0x484   :  { %v1251_v15 = vmul.f32 0.0078125, %v1225_v54  ;;  %v1259_v43 = vmul.f32 0.0078125, %v1241_v46  ;;  %3309 = vrsqrt.f32 %v1265_v37  ;;  %v3302_v19 = vpop.eup %3301 }
 0x485   :  { %3311 = vrsqrt.f32 %v1273_v39  ;;  %v1294_v42 = vmul.f32 %v3302_v19, %v3930_v6  ;;  %v1351_v18 = vmax.f32 %v1335_v27, 0.0  ;;  %v1323_v51 = vmul.f32 %v4022_v3, %v1303_v23 }
 0x486   :  { %v1267_v4 = vadd.f32 1e-05, %v1251_v15  ;;  %v1275_v36 = vadd.f32 1e-05, %v1259_v43  ;;  %3313 = vrsqrt.f32 %v1266_v40  ;;  %v3304_v50 = vpop.eup %3303 }
 0x487   :  { %v1227_v49 = vpop.xlane.xlu0 %1226  ;;  %v1243_v8 = vpop.xlane.xlu1 %1242  ;;  %3315 = vrsqrt.f32 %v1274_v1  ;;  %v1296_v56 = vmul.f32 %v3304_v50, %v3947_v32  ;;  %v1314_v30 = vmul.f32 %v4022_v3, %v1294_v42  ;;  %v1372_v54 = vrot.slane %v1351_v18, 4 }
 0x488   :  { %v1252_v52 = vmul.f32 0.0078125, %v1227_v49  ;;  %v1260_v14 = vmul.f32 0.0078125, %v1243_v8  ;;  %3317 = vrsqrt.f32 %v1267_v4  ;;  %v3306_v26 = vpop.eup %3305 }
 0x489   :  { %3319 = vrsqrt.f32 %v1275_v36  ;;  %v3308_v47 = vpop.eup %3307  ;;  %v1304_v12 = vmul.f32 %v3306_v26, %v3949_v63  ;;  %v1316_v21 = vmul.f32 %v4022_v3, %v1296_v56  ;;  %v1334_v40 = vadd.f32 %v4030_v48, %v1314_v30 }
 0x48a   :  { %v1268_v20 = vadd.f32 1e-05, %v1252_v52  ;;  %v1276_v33 = vadd.f32 1e-05, %v1260_v14  ;;  %v1302_v5 = vmul.f32 %v3308_v47, %v3939_v2  ;;  %v1343_v2 = vadd.f32 %v4030_v48, %v1323_v51 }
 0x48b   :  { %v1324_v24 = vmul.f32 %v4022_v3, %v1304_v12  ;;  %v1336_v43 = vadd.f32 %v4030_v48, %v1316_v21  ;;  %v1373_v8 = vmax.f32 %v1351_v18, %v1372_v54  ;;  %v1350_v14 = vmax.f32 %v1334_v40, 0.0 }
 0x48c   :  { %3321 = vrsqrt.f32 %v1268_v20  ;;  %v1322_v46 = vmul.f32 %v4022_v3, %v1302_v5  ;;  %v1359_v36 = vmax.f32 %v1343_v2, 0.0  ;;  %v1229_v20 = vpop.xlane.xlu0 %1228 }
 0x48d   :  { %3323 = vrsqrt.f32 %v1276_v33  ;;  %v1352_v41 = vmax.f32 %v1336_v43, 0.0  ;;  %v1374_v27 = vrot.slane %v1373_v8, 2 }
 0x48e   :  { %v3310_v45 = vpop.eup %3309  ;;  %v1420_v47 = vrot.slane %v1359_v36, 4 }
 0x48f   :  { %v3312_v16 = vpop.eup %3311  ;;  %v1297_v6 = vmul.f32 %v3310_v45, %v3963_v29  ;;  %v1378_v18 = vrot.slane %v1352_v41, 4 }
 0x490   :  { %v3314_v25 = vpop.eup %3313  ;;  %v1305_v63 = vmul.f32 %v3312_v16, %v3965_v38  ;;  %v1344_v38 = vadd.f32 %v4030_v48, %v1324_v24  ;;  %v1253_v16 = vmul.f32 0.0078125, %v1229_v20 }
 0x491   :  { %v3316_v60 = vpop.eup %3315  ;;  %v1298_v39 = vmul.f32 %v3314_v25, %v3955_v0  ;;  %v1317_v29 = vmul.f32 %v4022_v3, %v1297_v6  ;;  %v1342_v0 = vadd.f32 %v4030_v48, %v1322_v46  ;;  %v1245_v6 = vpop.xlane.xlu1 %1244 }
 0x492   :  { %v3318_v32 = vpop.eup %3317  ;;  %v1306_v15 = vmul.f32 %v3316_v60, %v3957_v53  ;;  %v1325_v1 = vmul.f32 %v4022_v3, %v1305_v63  ;;  %v1360_v50 = vmax.f32 %v1344_v38, 0.0  ;;  %v1366_v60 = vrot.slane %v1350_v14, 4 }
 0x493   :  { %v3320_v37 = vpop.eup %3319  ;;  %v1299_v35 = vmul.f32 %v3318_v32, %v3972_v7  ;;  %v1318_v52 = vmul.f32 %v4022_v3, %v1298_v39  ;;  %v1337_v7 = vadd.f32 %v4030_v48, %v1317_v29  ;;  %v1358_v23 = vmax.f32 %v1342_v0, 0.0 }
 0x494   :  { %v1307_v4 = vmul.f32 %v3320_v37, %v3975_v22  ;;  %v1326_v58 = vmul.f32 %v4022_v3, %v1306_v15  ;;  %v1345_v22 = vadd.f32 %v4030_v48, %v1325_v1  ;;  %v1421_v37 = vmax.f32 %v1359_v36, %v1420_v47 }
 0x495   :  { %v1319_v19 = vmul.f32 %v4022_v3, %v1299_v35  ;;  %v1338_v56 = vadd.f32 %v4030_v48, %v1318_v52  ;;  %v1353_v5 = vmax.f32 %v1337_v7, 0.0  ;;  %v1414_v32 = vrot.slane %v1358_v23, 4 }
 0x496   :  { %v3322_v49 = vpop.eup %3321  ;;  %v1327_v33 = vmul.f32 %v4022_v3, %v1307_v4  ;;  %v1346_v45 = vadd.f32 %v4030_v48, %v1326_v58  ;;  %v1361_v30 = vmax.f32 %v1345_v22, 0.0  ;;  %v1269_v2 = vadd.f32 1e-05, %v1253_v16 }
 0x497   :  { %v3324_v53 = vpop.eup %3323  ;;  %v1300_v26 = vmul.f32 %v3322_v49, %v3982_v57  ;;  %v1339_v51 = vadd.f32 %v4030_v48, %v1319_v19  ;;  %v1426_v57 = vrot.slane %v1360_v50, 4  ;;  %v1354_v54 = vmax.f32 %v1338_v56, 0.0 }
 0x498   :  { %v1308_v42 = vmul.f32 %v3324_v53, %v3985_v34  ;;  %v1347_v21 = vadd.f32 %v4030_v48, %v1327_v33  ;;  %v4070_v34 = vmax.f32 %v1373_v8, %v1374_v27  ;;  %v1362_v46 = vmax.f32 %v1346_v45, 0.0 }
 0x499   :  { %v1320_v12 = vmul.f32 %v4022_v3, %v1300_v26  ;;  %v1379_v39 = vmax.f32 %v1352_v41, %v1378_v18  ;;  %v1384_v15 = vrot.slane %v1353_v5, 4  ;;  %v1355_v40 = vmax.f32 %v1339_v51, 0.0 }
 0x49a   :  { %v1328_v25 = vmul.f32 %v4022_v3, %v1308_v42  ;;  %v1261_v43 = vmul.f32 0.0078125, %v1245_v6  ;;  %v1427_v29 = vmax.f32 %v1360_v50, %v1426_v57  ;;  %v1432_v35 = vrot.slane %v1361_v30, 4 }
 0x49b   :  { %v1340_v24 = vadd.f32 %v4030_v48, %v1320_v12  ;;  %v1363_v38 = vmax.f32 %v1347_v21, 0.0  ;;  %3325 = vrsqrt.f32 %v1269_v2  ;;  %v1367_v8 = vmax.f32 %v1350_v14, %v1366_v60 }
 0x49c   :  { %v1348_v63 = vadd.f32 %v4030_v48, %v1328_v25  ;;  %v1277_v49 = vadd.f32 1e-05, %v1261_v43  ;;  %v1422_v0 = vrot.slane %v1421_v37, 2  ;;  %v1390_v53 = vrot.slane %v1354_v54, 4 }
 0x49d   :  { %v1356_v1 = vmax.f32 %v1340_v24, 0.0  ;;  %v1438_v52 = vrot.slane %v1362_v46, 4  ;;  %v1415_v58 = vmax.f32 %v1358_v23, %v1414_v32  ;;  %v1385_v36 = vmax.f32 %v1353_v5, %v1384_v15 }
 0x49e   :  { %v1364_v4 = vmax.f32 %v1348_v63, 0.0  ;;  %v1396_v7 = vrot.slane %v1355_v40, 4  ;;  %3327 = vrsqrt.f32 %v1277_v49  ;;  %v1368_v19 = vrot.slane %v1367_v8, 2 }
 0x49f   :  { %v1380_v41 = vrot.slane %v1379_v39, 2  ;;  %v1433_v20 = vmax.f32 %v1361_v30, %v1432_v35  ;;  %v1444_v22 = vrot.slane %v1363_v38, 4  ;;  %v1416_v33 = vrot.slane %v1415_v58, 2 }
 0x4a0   :  { %v1428_v50 = vrot.slane %v1427_v29, 2  ;;  %v1402_v26 = vrot.slane %v1356_v1, 4  ;;  %v1450_v27 = vrot.slane %v1364_v4, 4  ;;  %v1369_v47 = vmax.f32 %v1367_v8, %v1368_v19 }
 0x4a1   :  { %v1423_v42 = vmax.f32 %v1421_v37, %v1422_v0  ;;  %v1391_v56 = vmax.f32 %v1354_v54, %v1390_v53  ;;  %v1439_v45 = vmax.f32 %v1362_v46, %v1438_v52  ;;  %v1417_v14 = vmax.f32 %v1415_v58, %v1416_v33 }
 0x4a2   :  { %v1376_v12 = vrot.slane %v4070_v34, 1  ;;  %v1386_v16 = vrot.slane %v1385_v36, 2  ;;  %v1397_v23 = vmax.f32 %v1355_v40, %v1396_v7  ;;  %v1370_v18 = vrot.slane %v1369_v47, 1 }
 0x4a3   :  { %v1381_v5 = vmax.f32 %v1379_v39, %v1380_v41  ;;  %v1434_v51 = vrot.slane %v1433_v20, 2  ;;  %v1445_v25 = vmax.f32 %v1363_v38, %v1444_v22  ;;  %v1418_v60 = vrot.slane %v1417_v14, 1 }
 0x4a4   :  { %v1429_v57 = vmax.f32 %v1427_v29, %v1428_v50  ;;  %v1403_v30 = vmax.f32 %v1356_v1, %v1402_v26  ;;  %v1451_v21 = vmax.f32 %v1364_v4, %v1450_v27  ;;  %v1371_v6 = vmax.f32 %v1369_v47, %v1370_v18 }
 0x4a5   :  { %v3326_v32 = vpop.eup %3325  ;;  %v1424_v24 = vrot.slane %v1423_v42, 1  ;;  %v1392_v63 = vrot.slane %v1391_v56, 2  ;;  %v1440_v37 = vrot.slane %v1439_v45, 2  ;;  %v1419_v54 = vmax.f32 %v1417_v14, %v1418_v60 }
 0x4a6   :  { %v1387_v46 = vmax.f32 %v1385_v36, %v1386_v16  ;;  %v1398_v2 = vrot.slane %v1397_v23, 2  ;;  %v1301_v15 = vmul.f32 %v3326_v32, %v3992_v17  ;;  %v1462_v43 = vpack.c.bf16 %v1371_v6, %v1371_v6 }
 0x4a7   :  { %v1382_v40 = vrot.slane %v1381_v5, 1  ;;  %v1435_v35 = vmax.f32 %v1433_v20, %v1434_v51  ;;  %v1446_v39 = vrot.slane %v1445_v25, 2  ;;  %v1470_v49 = vpack.c.bf16 %v1419_v54, %v1419_v54 }
 0x4a8   :  { %v3328_v38 = vpop.eup %3327  ;;  %v1430_v8 = vrot.slane %v1429_v57, 1  ;;  %v1404_v29 = vrot.slane %v1403_v30, 2  ;;  %v1452_v1 = vrot.slane %v1451_v21, 2  ;;  %v1321_v4 = vmul.f32 %v4022_v3, %v1301_v15 }
 0x4a9   :  { %v1393_v0 = vmax.f32 %v1391_v56, %v1392_v63  ;;  %v1309_v53 = vmul.f32 %v3328_v38, %v3995_v55  ;;  %v4078_v52 = vunpack.c.l.b16 %v1462_v43  ;;  %v4080_v58 = vunpack.c.l.b16 %v1470_v49 }
 0x4aa   :  { %v1441_v36 = vmax.f32 %v1439_v45, %v1440_v37  ;;  %v1388_v17 = vrot.slane %v1387_v46, 1  ;;  %v1399_v7 = vmax.f32 %v1397_v23, %v1398_v2  ;;  %v1341_v19 = vadd.f32 %v4030_v48, %v1321_v4 }
 0x4ab   :  { %v1436_v41 = vrot.slane %v1435_v35, 1  ;;  %v1447_v20 = vmax.f32 %v1445_v25, %v1446_v39  ;;  %v1329_v22 = vmul.f32 %v4022_v3, %v1309_v53  ;;  %v1647_v33 = vsel %vm827_vm3, %v4080_v58, %v4078_v52 }
 0x4ac   :  { %v1405_v50 = vmax.f32 %v1403_v30, %v1404_v29  ;;  %v1453_v26 = vmax.f32 %v1451_v21, %v1452_v1  ;;  %v1357_v55 = vmax.f32 %v1341_v19, 0.0  ;;  %v1648_v27 = vpack.c.b16 %v1647_v33, %v1647_v33 }
 0x4ad   :  { %v1394_v47 = vrot.slane %v1393_v0, 1  ;;  %v1349_v56 = vadd.f32 %v4030_v48, %v1329_v22  ;;  %v1377_v45 = vmax.f32 %v4070_v34, %v1376_v12  ;;  %v1425_v14 = vmax.f32 %v1423_v42, %v1424_v24 }
 0x4ae   :  { %v1383_v16 = vmax.f32 %v1381_v5, %v1382_v40  ;;  %v1431_v23 = vmax.f32 %v1429_v57, %v1430_v8  ;;  %v1400_v18 = vrot.slane %v1399_v7, 1  ;;  %v1408_v51 = vrot.slane %v1357_v55, 4  ;;  %3131 = vmatmul.mubr.bf16.vlgmr.msra.gmra.mrb[12].mxu0 %v1648_v27 }
 0x4af   :  { %v1389_v3 = vmax.f32 %v1387_v46, %v1388_v17  ;;  %v1437_v25 = vmax.f32 %v1435_v35, %v1436_v41  ;;  %v1448_v60 = vrot.slane %v1447_v20, 1  ;;  %v1365_v6 = vmax.f32 %v1349_v56, 0.0 }
 0x4b0   :  { %v1442_v32 = vrot.slane %v1441_v36, 1  ;;  %v1409_v30 = vmax.f32 %v1357_v55, %v1408_v51  ;;  %v1406_v21 = vrot.slane %v1405_v50, 1  ;;  %v1454_v63 = vrot.slane %v1453_v26, 1 }
 0x4b1   :  { %v1395_v37 = vmax.f32 %v1393_v0, %v1394_v47  ;;  %v1456_v54 = vrot.slane %v1365_v6, 4  ;;  %v1463_v2 = vpack.c.bf16 %v1377_v45, %v1377_v45  ;;  %v1471_v48 = vpack.c.bf16 %v1425_v14, %v1425_v14 }
 0x4b2   :  { %v1464_v15 = vpack.c.bf16 %v1383_v16, %v1383_v16  ;;  %v1472_v34 = vpack.c.bf16 %v1431_v23, %v1431_v23  ;;  %v1410_v42 = vrot.slane %v1409_v30, 2  ;;  %v1401_v12 = vmax.f32 %v1399_v7, %v1400_v18 }
 0x4b3   :  { %v1465_v5 = vpack.c.bf16 %v1389_v3, %v1389_v3  ;;  %v1473_v57 = vpack.c.bf16 %v1437_v25, %v1437_v25  ;;  %v1457_v24 = vmax.f32 %v1365_v6, %v1456_v54  ;;  %v1449_v43 = vmax.f32 %v1447_v20, %v1448_v60 }
 0x4b4   :  { %v1443_v46 = vmax.f32 %v1441_v36, %v1442_v32  ;;  %v1407_v40 = vmax.f32 %v1405_v50, %v1406_v21  ;;  %v1411_v35 = vmax.f32 %v1409_v30, %v1410_v42  ;;  %v1455_v39 = vmax.f32 %v1453_v26, %v1454_v63 }
 0x4b5   :  { %v1466_v49 = vpack.c.bf16 %v1395_v37, %v1395_v37  ;;  %v1458_v38 = vrot.slane %v1457_v24, 2  ;;  %v1511_v8 = vunpack.c.l.b16 %v1463_v2  ;;  %v1519_v29 = vunpack.c.l.b16 %v1471_v48 }
 0x4b6   :  { %v1512_v1 = vunpack.c.l.b16 %v1464_v15  ;;  %v1520_v4 = vunpack.c.l.b16 %v1472_v34  ;;  %v1412_v0 = vrot.slane %v1411_v35, 1  ;;  %v1467_v53 = vpack.c.bf16 %v1401_v12, %v1401_v12 }
 0x4b7   :  { %v1513_v17 = vunpack.c.l.b16 %v1465_v5  ;;  %v1521_v19 = vunpack.c.l.b16 %v1473_v57  ;;  %v1459_v41 = vmax.f32 %v1457_v24, %v1458_v38  ;;  %v1475_v7 = vpack.c.bf16 %v1449_v43, %v1449_v43 }
 0x4b8   :  { %v1474_v22 = vpack.c.bf16 %v1443_v46, %v1443_v46  ;;  %v1413_v33 = vmax.f32 %v1411_v35, %v1412_v0  ;;  %v1468_v55 = vpack.c.bf16 %v1407_v40, %v1407_v40  ;;  %v1476_v20 = vpack.c.bf16 %v1455_v39, %v1455_v39 }
 0x4b9   :  { %v1526_v36 = vsel %vm827_vm3, %v1511_v8, %v4078_v52  ;;  %v1533_v50 = vsel %vm827_vm3, %v1519_v29, %v4080_v58  ;;  %v1460_v26 = vrot.slane %v1459_v41, 1  ;;  %v1515_v45 = vunpack.c.l.b16 %v1467_v53 }
 0x4ba   :  { %v1527_v27 = vsel %vm829_vm4, %v1512_v1, %v1526_v36  ;;  %v1534_v47 = vsel %vm829_vm4, %v1520_v4, %v1533_v50  ;;  %v1469_v56 = vpack.c.bf16 %v1413_v33, %v1413_v33  ;;  %v1523_v18 = vunpack.c.l.b16 %v1475_v7 }
 0x4bb   :  { %v1528_v14 = vsel %vm831_vm5, %v1513_v17, %v1527_v27  ;;  %v1535_v16 = vsel %vm831_vm5, %v1521_v19, %v1534_v47  ;;  %v1461_v23 = vmax.f32 %v1459_v41, %v1460_v26  ;;  %v1514_v51 = vunpack.c.l.b16 %v1466_v49 }
 0x4bc   :  { %v1522_v3 = vunpack.c.l.b16 %v1474_v22  ;;  %v1516_v25 = vunpack.c.l.b16 %v1468_v55  ;;  %v1524_v52 = vunpack.c.l.b16 %v1476_v20  ;;  %v1517_v6 = vunpack.c.l.b16 %v1469_v56 }
 0x4bd   :  { %v1477_v60 = vpack.c.bf16 %v1461_v23, %v1461_v23  ;;  %v1529_v58 = vsel %vm833_vm6, %v1514_v51, %v1528_v14  ;;  %v1784_v53 = vand.u32 127, %v60_v9  ;;  %v3431_v50 = vmov 0  }
 0x4be   :  { %v1536_v32 = vsel %vm833_vm6, %v1522_v3, %v1535_v16  ;;  %v1530_v21 = vsel %vm835_vm7, %v1515_v45, %v1529_v58  ;;  %3159 = vset.pattern.permute.xlu0 %v3431_v50  ;;  %3158 = vset.pattern.permute.xlu1 %v3431_v50 }
 0x4bf   :  { %v1525_v30 = vunpack.c.l.b16 %v1477_v60  ;;  %v1537_v63 = vsel %vm835_vm7, %v1523_v18, %v1536_v32  ;;  %v1531_v37 = vsel %vm837_vm8, %v1516_v25, %v1530_v21  ;;  %v1787_v19 = vsub.s32 %v1784_v53, %v3513_v10 }
 0x4c0   :  { %v1538_v54 = vsel %vm837_vm8, %v1524_v52, %v1537_v63  ;;  %v1532_v2 = vsel %vm839_vm9, %v1517_v6, %v1531_v37 }
 0x4c1   :  { %v1539_v48 = vsel %vm839_vm9, %v1525_v30, %v1538_v54  ;;  %v3193_v54 = vld [vmem:[#allocation2 + $0xd0] ss:$8 sps:$4 sm:$0xff]  }
 0x4c2   :  { %v1540_v15 = vpack.c.b16 %v1539_v48, %v1532_v2  ;;  %v3194_v2 = vld [vmem:[#allocation2 + $0xe0] ss:$8 sps:$4 sm:$0xff]   ;;  %v3195_v48 = vld [vmem:[#allocation2 + $0xf0] ss:$8 sps:$4 sm:$0xff]  }
 0x4c4   :  { %3111 = vmatmul.mubr.bf16.vlgmr.msra.gmra.mrb[24].mxu1 %v1540_v15  ;;  %v3196_v15 = vld [vmem:[#allocation2 + $0x100] ss:$8 sps:$4 sm:$0xff]  }
 0x4c5   :  { %3142 = vmatprep.mubr.msk.bf16.mxu1 %vm3429_vm2, %v3428_v28  ;;  %3135 = vmatpush3.bf16.msra.mxu1 %v3193_v54 }
 0x4c6   :  { %3136 = vmatprep.subr.bf16.mxu1 %v3428_v28 }
 0x4c9   :  { %3137 = vmatpush3.bf16.msra.mxu1 %v3194_v2 }
 0x4ca   :  { %3138 = vmatprep.subr.bf16.mxu1 %v3428_v28 }
 0x4cd   :  { %3139 = vmatpush3.bf16.msra.mxu1 %v3195_v48 }
 0x4ce   :  { %3140 = vmatprep.subr.bf16.mxu1 %v3428_v28 }
 0x4d1   :  { %3141 = vmatpush3.bf16.msra.mxu1 %v3196_v15 }
 0x581   :  { %v1732_v34 = vpop.f32.mrb[12].mxu0 }
 0x582   :  { %v3132_v42 = vpop.f32.mrb[13].mxu0  ;;  %v1745_v57 = vrot.slane %v1732_v34, %v3840_v31 }
 0x583   :  { %v1735_v12 = vpop.f32.mrb[14].mxu0 }
 0x584   :  { %v3133_v5 = vpop.f32.mrb[15].mxu0  ;;  %v1746_v24 = vcombine.high %v1745_v57, %v1745_v57  ;;  %v1753_v43 = vrot.slane %v1745_v57, %v3840_v31 }
 0x586   :  { %v1760_v46 = vrot.slane %v1746_v24, %v3840_v31  ;;  %v1764_v40 = vrot.slane %v1753_v43, %v3516_v11 }
 0x588   :  { %v1768_v38 = vrot.slane %v1760_v46, %v3516_v11 }
 0x597   :  { %v4111_v35 = vpop.f32.mrb[24].mxu1 }
 0x598   :  { %v1771_v39 = vmul.f32 %v1764_v40, %v4111_v35  ;;  %v3112_v49 = vpop.f32.mrb[25].mxu1 }
 0x599   :  { %v4115_v8 = vpop.f32.mrb[26].mxu1 }
 0x59a   :  { %v1772_v29 = vmul.f32 %v1768_v38, %v4115_v8  ;;  %v3113_v1 = vpop.f32.mrb[27].mxu1  ;;  %v1773_v4 = vsel %vm232_vm1, %v1771_v39, 0.0 }
 0x59b   :  { %1774 = vadd.xlane.f32.xlu0 %v1773_v4 }
 0x59c   :  { %v1776_v0 = vsel %vm232_vm1, %v1772_v29, 0.0 }
 0x59d   :  { %1777 = vadd.xlane.f32.xlu1 %v1776_v0  ;;  %v3199_v0 = vld [vmem:[#allocation2 + $0x114] ss:$8 sps:$4 sm:$0xff]  }
 0x59e   :  { %2069 = vmatprep.subr.bf16.mxu1 %v3199_v0 }
 0x628   :  { %v1775_v17 = vpop.xlane.xlu0 %1774 }
 0x629   :  { %v1779_v41 = vmul.f32 0.125, %v1775_v17 }
 0x62a   :  { %v1778_v7 = vpop.xlane.xlu1 %1777 }
 0x62b   :  { %v1780_v22 = vmul.f32 0.125, %v1778_v7  ;;  %v1788_v33 = vrot.slane %v1779_v41, %v1787_v19 }
 0x62d   :  { %v1792_v55 = vrot.slane %v1780_v22, %v1787_v19 }
 0x62f   :  { %v1793_v20 = vsel %vm827_vm3, %v1792_v55, %v1788_v33  ;;  %v3197_v33 = vld [vmem:[#allocation2 + $0x110] ss:$8 sps:$4 sm:$0xff]   ;;  %v3202_v55 = vld [vmem:[#allocation2 + $0x124] ss:$8 sps:$4 sm:$0xff]  }
 0x630   :  { %v1796_v36 = vsel %vm1795_vm10, %v1793_v20, -inf }
 0x631   :  { %1797 = vmax.xlane.f32.xlu0 %v1796_v36  ;;  %v3200_v36 = vld [vmem:[#allocation2 + $0x120] ss:$8 sps:$4 sm:$0xff]  }
 0x6be   :  { %v1798_v9 = vpop.xlane.xlu0 %1797 }
 0x6bf   :  { %v1803_v26 = vrot.slane %v1798_v9, %v3516_v11  ;;  %v1807_v27 = vrot.slane %v1798_v9, %v3694_v59  ;;  %v3205_v9 = vld [vmem:[#allocation2 + $0x134] ss:$8 sps:$4 sm:$0xff]  }
 0x6c1   :  { %v1810_v47 = vsub.f32 %v1779_v41, %v1803_v26  ;;  %v1811_v56 = vsub.f32 %v1780_v22, %v1807_v27  ;;  %v3203_v26 = vld [vmem:[#allocation2 + $0x130] ss:$8 sps:$4 sm:$0xff]   ;;  %v3208_v27 = vld [vmem:[#allocation2 + $0x144] ss:$8 sps:$4 sm:$0xff]  }
 0x6c3   :  { %v1812_v45 = vmul.f32 1.442695, %v1810_v47  ;;  %v1814_v14 = vmul.f32 1.442695, %v1811_v56  ;;  %v3206_v47 = vld [vmem:[#allocation2 + $0x140] ss:$8 sps:$4 sm:$0xff]  }
 0x6c4   :  { %v3211_v56 = vld [vmem:[#allocation2 + $0x154] ss:$8 sps:$4 sm:$0xff]  }
 0x6c5   :  { %3329 = vpow2.f32 %v1812_v45  ;;  %v3209_v45 = vld [vmem:[#allocation2 + $0x150] ss:$8 sps:$4 sm:$0xff]  }
 0x6c6   :  { %3331 = vpow2.f32 %v1814_v14  ;;  %v3214_v14 = vld [vmem:[#allocation2 + $0x164] ss:$8 sps:$4 sm:$0xff]  }
 0x6cf   :  { %v3330_v16 = vpop.eup %3329 }
 0x6d0   :  { %v3332_v23 = vpop.eup %3331  ;;  %1819 = vperm.xlu1 %3158, %v3330_v16  }
 0x6d1   :  { %1822 = vperm.xlu0 %3159, %v3332_v23  }
 0x74f   :  { %v1820_v18 = vpop.permute.xlu1 %1819 }
 0x750   :  { %v1823_v51 = vpop.permute.xlu0 %1822  ;;  %v1827_v3 = vrot.slane %v1820_v18, %v1787_v19  ;;  %v3215_v18 = vld [vmem:[#allocation2 + $0x170] ss:$8 sps:$4 sm:$0xff]  }
 0x751   :  { %v1831_v25 = vrot.slane %v1823_v51, %v1787_v19  ;;  %v3220_v51 = vld [vmem:[#allocation2 + $0x184] ss:$8 sps:$4 sm:$0xff]  }
 0x753   :  { %v1832_v52 = vsel %vm827_vm3, %v1831_v25, %v1827_v3  ;;  %v3218_v3 = vld [vmem:[#allocation2 + $0x180] ss:$8 sps:$4 sm:$0xff]  }
 0x754   :  { %v1834_v60 = vsel %vm1795_vm10, %v1832_v52, 0.0 }
 0x755   :  { %1835 = vadd.xlane.f32.xlu1 %v1834_v60 }
 0x7e2   :  { %v1836_v6 = vpop.xlane.xlu1 %1835 }
 0x7e3   :  { %v1841_v58 = vrot.slane %v1836_v6, %v3516_v11  ;;  %v1845_v32 = vrot.slane %v1836_v6, %v3694_v59 }
 0x7e5   :  { %3333 = vrcp.f32 %v1841_v58 }
 0x7e6   :  { %3335 = vrcp.f32 %v1845_v32  ;;  %v4142_v32 = vsub.s32 6, %v3513_v10 }
 0x7ef   :  { %v3334_v30 = vpop.eup %3333 }
 0x7f0   :  { %v1849_v21 = vmul.f32 %v3334_v30, %v3330_v16  ;;  %v3336_v63 = vpop.eup %3335  ;;  %v3212_v16 = vld [vmem:[#allocation2 + $0x160] ss:$8 sps:$4 sm:$0xff]   ;;  %v4147_v30 = vld [vmem:[%s4275_s3 + $0x8] sm:$0xff] }
 0x7f1   :  { %v1851_v37 = vmul.f32 %v3336_v63, %v3332_v23  ;;  %v3217_v23 = vld [vmem:[#allocation2 + $0x174] ss:$8 sps:$4 sm:$0xff]  }
 0x7f2   :  { %1854 = vperm.xlu0 %3159, %v1849_v21   ;;  %v4152_v21 = vld [vmem:[%s4275_s3] sm:$0xff] }
 0x7f3   :  { %v1984_v63 = vrot.slane %v4152_v21, %v4142_v32 }
 0x7f6   :  { %1859 = vperm.xlu0 %3159, %v1851_v37   ;;  %v1988_v37 = vrot.slane %v4147_v30, %v4142_v32 }
 0x871   :  { %v1855_v34 = vpop.permute.xlu0 %1854 }
 0x872   :  { %v1862_v42 = vmul.f32 %v1855_v34, %v4111_v35 }
 0x874   :  { %v1865_v12 = vsel %vm1864_vm11, %v1862_v42, 0.0 }
 0x875   :  { %v1866_v5 = vrot.slane %v1865_v12, 4  ;;  %v1860_v57 = vpop.permute.xlu0 %1859 }
 0x876   :  { %v1863_v24 = vmul.f32 %v1860_v57, %v4115_v8  ;;  %v3221_v57 = vld [vmem:[#allocation2 + $0x210] ss:$8 sps:$4 sm:$0xff]  }
 0x877   :  { %v1867_v43 = vadd.f32 %v1866_v5, %v1865_v12  ;;  %2996 = vmatprep.subr.bf16.mxu0 %v3221_v57 }
 0x878   :  { %v1872_v46 = vsel %vm1864_vm11, %v1863_v24, 0.0  ;;  %v3222_v24 = vld [vmem:[#allocation2 + $0x190] ss:$8 sps:$4 sm:$0xff]  }
 0x879   :  { %v1868_v40 = vrot.slane %v1867_v43, 2  ;;  %v1873_v39 = vrot.slane %v1872_v46, 4  ;;  %2997 = vmatpush3.bf16.msra.mxu0 %v3222_v24 }
 0x87b   :  { %v1869_v49 = vadd.f32 %v1868_v40, %v1867_v43  ;;  %v1874_v38 = vadd.f32 %v1873_v39, %v1872_v46  ;;  %v3223_v43 = vld [vmem:[#allocation2 + $0x220] ss:$8 sps:$4 sm:$0xff]  }
 0x87c   :  { %v3224_v46 = vld [vmem:[#allocation2 + $0x1a0] ss:$8 sps:$4 sm:$0xff]   ;;  %2998 = vmatprep.subr.bf16.mxu0 %v3223_v43 }
 0x87d   :  { %v1870_v29 = vrot.slane %v1869_v49, 1  ;;  %v1875_v1 = vrot.slane %v1874_v38, 2  ;;  %2999 = vmatpush3.bf16.msra.mxu0 %v3224_v46 }
 0x87f   :  { %v1871_v4 = vadd.f32 %v1870_v29, %v1869_v49  ;;  %v1876_v28 = vadd.f32 %v1875_v1, %v1874_v38 }
 0x881   :  { %v1877_v53 = vrot.slane %v1876_v28, 1  ;;  %v1879_v17 = vpack.c.bf16 %v1871_v4, %v1871_v4 }
 0x883   :  { %v1878_v35 = vadd.f32 %v1877_v53, %v1876_v28  ;;  %v1891_v41 = vunpack.c.l.b16 %v1879_v17  ;;  %v3225_v53 = vld [vmem:[#allocation2 + $0x230] ss:$8 sps:$4 sm:$0xff]  }
 0x884   :  { %v3226_v17 = vld [vmem:[#allocation2 + $0x1b0] ss:$8 sps:$4 sm:$0xff]   ;;  %3000 = vmatprep.subr.bf16.mxu0 %v3225_v53 }
 0x885   :  { %v1880_v19 = vpack.c.bf16 %v1878_v35, %v1878_v35  ;;  %3001 = vmatpush3.bf16.msra.mxu0 %v3226_v17  ;;  %v3227_v35 = vld [vmem:[#allocation2 + $0x240] ss:$8 sps:$4 sm:$0xff]  }
 0x886   :  { %3002 = vmatprep.subr.bf16.mxu0 %v3227_v35 }
 0x887   :  { %v1892_v7 = vunpack.c.l.b16 %v1880_v19  ;;  %v3228_v19 = vld [vmem:[#allocation2 + $0x1c0] ss:$8 sps:$4 sm:$0xff]  }
 0x889   :  { %v1893_v8 = vsel %vm827_vm3, %v1892_v7, %v1891_v41  ;;  %3003 = vmatpush3.bf16.msra.mxu0 %v3228_v19  ;;  %v3229_v41 = vld [vmem:[#allocation2 + $0x250] ss:$8 sps:$4 sm:$0xff]  }
 0x88a   :  { %v1894_v22 = vpack.c.b16 %v1893_v8, %v1893_v8  ;;  %v3230_v7 = vld [vmem:[#allocation2 + $0x1d0] ss:$8 sps:$4 sm:$0xff]   ;;  %v3231_v8 = vld [vmem:[#allocation2 + $0x260] ss:$8 sps:$4 sm:$0xff]   ;;  %3004 = vmatprep.subr.bf16.mxu0 %v3229_v41 }
 0x88c   :  { %1895 = vrot.lane.b32.xlu1 %v1894_v22, %s3432_s25  ;;  %v3232_v22 = vld [vmem:[#allocation2 + $0x1e0] ss:$8 sps:$4 sm:$0xff]  }
 0x88d   :  { %3005 = vmatpush3.bf16.msra.mxu0 %v3230_v7 }
 0x88e   :  { %3006 = vmatprep.subr.bf16.mxu0 %v3231_v8 }
 0x891   :  { %3007 = vmatpush3.bf16.msra.mxu0 %v3232_v22 }
 0x8fe   :  { %v1896_v20 = vpop.permute.xlu1 %1895 }
 0x8ff   :  { %3143 = vmatmul.mubr.msk.bf16.vlgmr.msra.gmra.mrb[28].mxu1 %vm232_vm1, %v1896_v20  ;;  %v3235_v20 = vld [vmem:[#allocation2 + $0x280] ss:$8 sps:$4 sm:$0xff]  }
 0x900   :  { %2070 = vmatpush1.bf16.msra.mxu1 %v3197_v33  ;;  %2101 = vmatprep.mubr.bf16.mxu1 %v3431_v50  ;;  %v3233_v33 = vld [vmem:[#allocation2 + $0x270] ss:$8 sps:$4 sm:$0xff]  }
 0x901   :  { %2071 = vmatprep.subr.bf16.mxu1 %v3202_v55  ;;  %v3234_v55 = vld [vmem:[#allocation2 + $0x1f0] ss:$8 sps:$4 sm:$0xff]   ;;  %3008 = vmatprep.subr.bf16.mxu0 %v3233_v33 }
 0x902   :  { %3009 = vmatpush3.bf16.msra.mxu0 %v3234_v55 }
 0x903   :  { %3010 = vmatprep.subr.bf16.mxu0 %v3235_v20 }
 0x904   :  { %2072 = vmatpush1.bf16.msra.mxu1 %v3200_v36  ;;  %v3236_v36 = vld [vmem:[#allocation2 + $0x200] ss:$8 sps:$4 sm:$0xff]  }
 0x905   :  { %2073 = vmatprep.subr.bf16.mxu1 %v3205_v9  ;;  %v57_v9 = vld [vmem:[%s4273_s1] sm:$0x3] }
 0x906   :  { %3011 = vmatpush3.bf16.msra.mxu0 %v3236_v36 }
 0x908   :  { %2074 = vmatpush1.bf16.msra.mxu1 %v3203_v26  ;;  %v2343_v26 = vrot.slane %v57_v9, %v3516_v11 }
 0x909   :  { %2075 = vmatprep.subr.bf16.mxu1 %v3208_v27  ;;  %v2350_v27 = vrot.slane %v57_v9, %v3694_v59 }
 0x90c   :  { %2076 = vmatpush1.bf16.msra.mxu1 %v3206_v47 }
 0x90d   :  { %2077 = vmatprep.subr.bf16.mxu1 %v3211_v56 }
 0x910   :  { %2078 = vmatpush1.bf16.msra.mxu1 %v3209_v45 }
 0x911   :  { %2079 = vmatprep.subr.bf16.mxu1 %v3214_v14  ;;  %v4168_v14 = vsub.s32 7, %v3513_v10 }
 0x914   :  { %2080 = vmatpush1.bf16.msra.mxu1 %v3212_v16  ;;  %v4173_v16 = vld [vmem:[%s4275_s3 + $0x18] sm:$0xff] }
 0x915   :  { %2081 = vmatprep.subr.bf16.mxu1 %v3217_v23  ;;  %v4178_v23 = vld [vmem:[%s4275_s3 + $0x10] sm:$0xff] }
 0x916   :  { %v2463_v10 = vrot.slane %v4178_v23, %v4017_v44 }
 0x918   :  { %2082 = vmatpush1.bf16.msra.mxu1 %v3215_v18  ;;  %v2135_v18 = vrot.slane %v4152_v21, %v4168_v14 }
 0x919   :  { %2083 = vmatprep.subr.bf16.mxu1 %v3220_v51  ;;  %v2139_v51 = vrot.slane %v4147_v30, %v4168_v14 }
 0x91c   :  { %2084 = vmatpush1.bf16.msra.mxu1 %v3218_v3 }
 0x9d2   :  { %v1958_v25 = vpop.f32.mrb[28].mxu1 }
 0x9d3   :  { %v1964_v52 = vpack.c.bf16 %v1958_v25, %v1958_v25  ;;  %v3144_v60 = vpop.f32.mrb[29].mxu1 }
 0x9d4   :  { %v1961_v6 = vpop.f32.mrb[30].mxu1  ;;  %v2149_v60 = vrot.slane %v4173_v16, %v3516_v11 }
 0x9d5   :  { %v3145_v58 = vpop.f32.mrb[31].mxu1  ;;  %2102 = vmatmul.mubr.bf16.vlgmr.msra.gmra.mrb[32].mxu1 %v1964_v52  ;;  %v2145_v6 = vrot.slane %v4178_v23, %v3516_v11 }
 0x9d6   :  { %2543 = vmatprep.mubr.bf16.mxu1 %v3431_v50 }
 0xaa8   :  { %v2103_v50 = vpop.f32.mrb[32].mxu1 }
 0xaa9   :  { %v2104_v54 = vadd.f32 %v2103_v50, %v1984_v63  ;;  %v2105_v2 = vpop.f32.mrb[33].mxu1 }
 0xaaa   :  { %v2106_v48 = vadd.f32 %v2105_v2, %v1988_v37  ;;  %v2107_v15 = vpop.f32.mrb[34].mxu1 }
 0xaab   :  { %v2108_v34 = vpop.f32.mrb[35].mxu1  ;;  %v2111_v42 = vsel %vm2110_vm12, %v2104_v54, 0.0 }
 0xaac   :  { %v2112_v12 = vsel %vm2110_vm12, %v2106_v48, 0.0  ;;  %v40_v34 = vld [vmem:[%s4275_s3 + $0x20] sm:$0xff]  ;;  %s3433_s3 = smov [#allocation5]  }
 0xaad   :  { %v2113_v5 = vadd.f32 %v2112_v12, %v2111_v42  ;;  %v2357_v57 = vrot.slane %v40_v34, %v3516_v11  ;;  %s2809_s13 = sshll.u32 %s3433_s3, 4  ;;  %s2810_s13 = int_to_ptr.vmem [resolvable:$true] %s2809_s13 }
 0xaae   :  { %s3375_s14 = scalar_lea.vmem %s2810_s13, 64  ;;  %p3380_p9 = scmp.lt.s32.totalorder %s2810_s13, %s2810_s13 }
 0xaaf   :  { %2114 = vadd.xlane.f32.xlu0 %v2113_v5  ;;  %v2203_v5 = vrot.slane %v4178_v23, %v3694_v59  ;;  %p3376_p8 = scmp.ne.s32.totalorder %s2810_s13, %s3375_s14  ;;  %p3381_p10 = scmp.lt.s32.totalorder %s3375_s14, %s3375_s14 }
 0xab1   :  { %p3382_p11 = por %p3381_p10, %p3380_p9 }
 0xab3   :  { %p3383_p12 = pnand %p3382_p11, %p3376_p8 }
 0xac5   :  { %2345 = vbcast.lane.b32.xlu0 %v2343_v26, 256 }
 0xac9   :  { %2362 = vbcast.lane.b32.xlu0 %v2343_v26, 264 }
 0xacd   :  { %2366 = vbcast.lane.b32.xlu0 %v2350_v27, 264 }
 0xb3c   :  { %v2115_v40 = vpop.xlane.xlu0 %2114 }
 0xb3d   :  { %v2117_v39 = vmul.f32 0.00390625, %v2115_v40  ;;  %v2371_v40 = vrot.slane %v40_v34, %v3694_v59 }
 0xb3f   :  { %v2118_v49 = vsub.f32 %v2104_v54, %v2117_v39  ;;  %v2119_v38 = vsub.f32 %v2106_v48, %v2117_v39 }
 0xb40   :  { %v2346_v30 = vpop.permute.xlu0 %2345 }
 0xb41   :  { %v2120_v29 = vmul.f32 %v2118_v49, %v2118_v49  ;;  %v2121_v1 = vmul.f32 %v2119_v38, %v2119_v38 }
 0xb43   :  { %v2122_v4 = vsel %vm2110_vm12, %v2120_v29, 0.0  ;;  %v2123_v28 = vsel %vm2110_vm12, %v2121_v1, 0.0  ;;  %v2358_v1 = vmul.f32 %v2357_v57, %v2346_v30 }
 0xb44   :  { %v2124_v0 = vadd.f32 %v2123_v28, %v2122_v4  ;;  %v2363_v42 = vpop.permute.xlu0 %2362 }
 0xb45   :  { %v2372_v28 = vmul.f32 %v2371_v40, %v2363_v42 }
 0xb46   :  { %2125 = vadd.xlane.f32.xlu1 %v2124_v0 }
 0xb47   :  { %v2374_v19 = vadd.f32 %v2372_v28, %v2358_v1 }
 0xb57   :  { %2352 = vbcast.lane.b32.xlu1 %v2350_v27, 256 }
 0xbd3   :  { %v2126_v47 = vpop.xlane.xlu1 %2125 }
 0xbd4   :  { %v2127_v56 = vmul.f32 0.00390625, %v2126_v47 }
 0xbd6   :  { %v2128_v45 = vadd.f32 1e-05, %v2127_v56 }
 0xbd7   :  { %v2353_v39 = vpop.permute.xlu1 %2352 }
 0xbd8   :  { %3337 = vrsqrt.f32 %v2128_v45  ;;  %v2359_v0 = vmul.f32 %v2357_v57, %v2353_v39 }
 0xbe2   :  { %v3338_v3 = vpop.eup %3337 }
 0xbe3   :  { %v2130_v25 = vmul.f32 %v3338_v3, %v2118_v49  ;;  %v2131_v52 = vmul.f32 %v3338_v3, %v2119_v38  ;;  %v2367_v38 = vpop.permute.xlu0 %2366  ;;  %v3237_v3 = vld [vmem:[#allocation2 + $0x290] ss:$8 sps:$4 sm:$0xff]  }
 0xbe4   :  { %v2373_v53 = vmul.f32 %v2371_v40, %v2367_v38 }
 0xbe5   :  { %v2141_v58 = vmul.f32 %v2139_v51, %v2131_v52  ;;  %v2140_v63 = vmul.f32 %v2135_v18, %v2130_v25  ;;  %v3239_v51 = vld [vmem:[#allocation2 + $0x294] ss:$8 sps:$4 sm:$0xff]   ;;  %v3240_v25 = vld [vmem:[#allocation2 + $0x2a0] ss:$8 sps:$4 sm:$0xff]   ;;  %v3242_v52 = vld [vmem:[#allocation2 + $0x2a4] ss:$8 sps:$4 sm:$0xff]  }
 0xbe6   :  { %v2375_v41 = vadd.f32 %v2373_v53, %v2359_v0  ;;  %2511 = vmatprep.subr.bf16.mxu1 %v3239_v51  ;;  %v3255_v51 = vld [vmem:[#allocation2 + $0x380] ss:$8 sps:$4 sm:$0xff]  }
 0xbe7   :  { %v2151_v37 = vadd.f32 %v2149_v60, %v2141_v58  ;;  %v2150_v50 = vadd.f32 %v2145_v6, %v2140_v63  ;;  %2512 = vmatpush1.bf16.msra.mxu1 %v3237_v3  ;;  %v3245_v60 = vld [vmem:[#allocation2 + $0x2b4] ss:$8 sps:$4 sm:$0xff]   ;;  %v3243_v6 = vld [vmem:[#allocation2 + $0x2b0] ss:$8 sps:$4 sm:$0xff]   ;;  %v3248_v58 = vld [vmem:[#allocation2 + $0x2c4] ss:$8 sps:$4 sm:$0xff]  }
 0xbe8   :  { %2513 = vmatprep.subr.bf16.mxu1 %v3242_v52  ;;  %v3246_v63 = vld [vmem:[#allocation2 + $0x2c0] ss:$8 sps:$4 sm:$0xff]   ;;  %v3258_v52 = vld [vmem:[#allocation2 + $0x310] ss:$8 sps:$4 sm:$0xff]  }
 0xbe9   :  { %v2153_v54 = vmax.f32 %v2151_v37, 0.0  ;;  %v2152_v2 = vmax.f32 %v2150_v50, 0.0  ;;  %v3256_v3 = vld [vmem:[#allocation2 + $0x300] ss:$8 sps:$4 sm:$0xff]  }
 0xbeb   :  { %v2167_v48 = vpack.c.bf16 %v2153_v54, %v2153_v54  ;;  %v2166_v21 = vpack.c.bf16 %v2152_v2, %v2152_v2  ;;  %v2156_v15 = vcombine.low %v2152_v2, %v2153_v54  ;;  %2514 = vmatpush1.bf16.msra.mxu1 %v3240_v25  ;;  %v3257_v25 = vld [vmem:[#allocation2 + $0x390] ss:$8 sps:$4 sm:$0xff]  }
 0xbec   :  { %2515 = vmatprep.subr.bf16.mxu1 %v3245_v60  ;;  %v3259_v60 = vld [vmem:[#allocation2 + $0x3a0] ss:$8 sps:$4 sm:$0xff]  }
 0xbed   :  { %2332 = vmatprep.mubr.bf16.mxu0 %v2167_v48  ;;  %2905 = vst.sshfl [vmem:[#allocation5] sm:$0x33 pattern:$0x76325410] %v2156_v15  ;;  %v2440_v15 = vrot.slane %v4178_v23, %v464_v62  ;;  %v2467_v62 = vrot.slane %v4173_v16, %v4017_v44 }
 0xbee   :  { %2333 = vmatmul.mubr.bf16.vlgmr.msra.gmra.mrb[16].mxu0 %v2166_v21 }
 0xbef   :  { %2516 = vmatpush1.bf16.msra.mxu1 %v3243_v6  ;;  %v3260_v6 = vld [vmem:[#allocation2 + $0x320] ss:$8 sps:$4 sm:$0xff]  }
 0xbf0   :  { %2517 = vmatprep.subr.bf16.mxu1 %v3248_v58  ;;  %v3261_v58 = vld [vmem:[#allocation2 + $0x3b0] ss:$8 sps:$4 sm:$0xff]  }
 0xbf3   :  { %2518 = vmatpush1.bf16.msra.mxu1 %v3246_v63  ;;  %v3262_v63 = vld [vmem:[#allocation2 + $0x330] ss:$8 sps:$4 sm:$0xff]  }
 0xcc1   :  { %v3012_v12 = vpop.f32.mrb[16].mxu0 }
 0xcc2   :  { %v3013_v24 = vpop.f32.mrb[17].mxu0 }
 0xcc3   :  { %v3014_v43 = vadd.f32 %v3013_v24, %v3012_v12  ;;  %v3015_v46 = vpop.f32.mrb[18].mxu0  ;;  %v2446_v12 = vrot.slane %v4178_v23, %v1115_v61 }
 0xcc4   :  { %v3016_v49 = vpop.f32.mrb[19].mxu0 }
 0xcc5   :  { %v2335_v29 = vadd.f32 %v3014_v43, %v2203_v5 }
 0xcc7   :  { %v2383_v4 = vrot.slane %v2335_v29, %v3840_v31 }
 0xcc9   :  { %v2384_v17 = vcombine.high %v2383_v4, %v2383_v4  ;;  %v2391_v35 = vrot.slane %v2383_v4, %v3840_v31 }
 0xccb   :  { %v2402_v7 = vrot.slane %v2391_v35, %v3516_v11  ;;  %v2398_v8 = vrot.slane %v2384_v17, %v3840_v31  ;;  %v3249_v17 = vld [vmem:[#allocation2 + $0x350] ss:$8 sps:$4 sm:$0xff]  }
 0xccc   :  { %3018 = vmatprep.subr.bf16.mxu0 %v3249_v17 }
 0xccd   :  { %v2409_v59 = vadd.f32 %v2402_v7, %v2374_v19  ;;  %v2406_v22 = vrot.slane %v2398_v8, %v3516_v11 }
 0xccf   :  { %v2411_v33 = vsel %vm232_vm1, %v2409_v59, 0.0  ;;  %v2410_v55 = vadd.f32 %v2406_v22, %v2375_v41 }
 0xcd0   :  { %2412 = vadd.xlane.f32.xlu0 %v2411_v33 }
 0xcd1   :  { %v2414_v20 = vsel %vm232_vm1, %v2410_v55, 0.0 }
 0xcd2   :  { %2415 = vadd.xlane.f32.xlu1 %v2414_v20 }
 0xd5d   :  { %v2413_v36 = vpop.xlane.xlu0 %2412 }
 0xd5e   :  { %v2417_v9 = vmul.f32 0.015625, %v2413_v36 }
 0xd5f   :  { %v2416_v26 = vpop.xlane.xlu1 %2415 }
 0xd60   :  { %v2419_v27 = vsub.f32 %v2409_v59, %v2417_v9  ;;  %v2418_v47 = vmul.f32 0.015625, %v2416_v26 }
 0xd62   :  { %v2420_v56 = vsub.f32 %v2410_v55, %v2418_v47  ;;  %v2421_v45 = vmul.f32 %v2419_v27, %v2419_v27 }
 0xd64   :  { %v2423_v18 = vsel %vm232_vm1, %v2421_v45, 0.0  ;;  %v2422_v31 = vmul.f32 %v2420_v56, %v2420_v56  ;;  %v3251_v45 = vld [vmem:[#allocation2 + $0x360] ss:$8 sps:$4 sm:$0xff]  }
 0xd65   :  { %2424 = vadd.xlane.f32.xlu0 %v2423_v18  ;;  %v3252_v18 = vld [vmem:[#allocation2 + $0x2e0] ss:$8 sps:$4 sm:$0xff]  }
 0xd66   :  { %v2426_v11 = vsel %vm232_vm1, %v2422_v31, 0.0  ;;  %v3253_v31 = vld [vmem:[#allocation2 + $0x370] ss:$8 sps:$4 sm:$0xff]  }
 0xd69   :  { %2427 = vadd.xlane.f32.xlu0 %v2426_v11  ;;  %v3254_v11 = vld [vmem:[#allocation2 + $0x2f0] ss:$8 sps:$4 sm:$0xff]  }
 0xdf2   :  { %v2425_v37 = vpop.xlane.xlu0 %2424 }
 0xdf3   :  { %v2429_v50 = vmul.f32 0.015625, %v2425_v37  ;;  %v3263_v37 = vld [vmem:[#allocation2 + $0x3c0] ss:$8 sps:$4 sm:$0xff]  }
 0xdf5   :  { %v2431_v54 = vadd.f32 1e-05, %v2429_v50  ;;  %v3264_v50 = vld [vmem:[#allocation2 + $0x340] ss:$8 sps:$4 sm:$0xff]  }
 0xdf6   :  { %v2428_v2 = vpop.xlane.xlu0 %2427 }
 0xdf7   :  { %3339 = vrsqrt.f32 %v2431_v54  ;;  %v2430_v48 = vmul.f32 0.015625, %v2428_v2 }
 0xdf9   :  { %v2432_v21 = vadd.f32 1e-05, %v2430_v48 }
 0xdfb   :  { %3341 = vrsqrt.f32 %v2432_v21 }
 0xe01   :  { %v3340_v30 = vpop.eup %3339 }
 0xe02   :  { %v2435_v34 = vmul.f32 %v3340_v30, %v2419_v27 }
 0xe04   :  { %v2441_v42 = vmul.f32 %v2440_v15, %v2435_v34 }
 0xe05   :  { %v3342_v5 = vpop.eup %3341 }
 0xe06   :  { %v2436_v57 = vmul.f32 %v3342_v5, %v2420_v56  ;;  %v2447_v43 = vadd.f32 %v2446_v12, %v2441_v42  ;;  %v3250_v56 = vld [vmem:[#allocation2 + $0x2d0] ss:$8 sps:$4 sm:$0xff]  }
 0xe07   :  { %3019 = vmatpush3.bf16.msra.mxu0 %v3250_v56 }
 0xe08   :  { %v2442_v24 = vmul.f32 %v2440_v15, %v2436_v57  ;;  %v2449_v40 = vmax.f32 %v2447_v43, 0.0  ;;  %3020 = vmatprep.subr.bf16.mxu0 %v3251_v45  ;;  %v2615_v43 = vrot.slane %v4173_v16, %v4025_v13 }
 0xe0a   :  { %v2448_v46 = vadd.f32 %v2446_v12, %v2442_v24 }
 0xe0b   :  { %3021 = vmatpush3.bf16.msra.mxu0 %v3252_v18 }
 0xe0c   :  { %v2450_v39 = vmax.f32 %v2448_v46, 0.0  ;;  %3022 = vmatprep.subr.bf16.mxu0 %v3253_v31 }
 0xe0e   :  { %v2451_v49 = vpack.c.bf16 %v2450_v39, %v2449_v40  ;;  %v2621_v39 = vrot.slane %v4173_v16, %v4142_v32 }
 0xe0f   :  { %3023 = vmatpush3.bf16.msra.mxu0 %v3254_v11 }
 0xe10   :  { %2930 = vmatmul.mubr.msk.bf16.vlgmr.msra.gmra.mrb[36].mxu1 %vm232_vm1, %v2451_v49  ;;  %3024 = vmatprep.subr.bf16.mxu0 %v3255_v51 }
 0xe13   :  { %3025 = vmatpush3.bf16.msra.mxu0 %v3256_v3 }
 0xe14   :  { %3026 = vmatprep.subr.bf16.mxu0 %v3257_v25 }
 0xe17   :  { %3027 = vmatpush3.bf16.msra.mxu0 %v3258_v52 }
 0xe18   :  { %3028 = vmatprep.subr.bf16.mxu0 %v3259_v60 }
 0xe1b   :  { %3029 = vmatpush3.bf16.msra.mxu0 %v3260_v6 }
 0xe1c   :  { %3030 = vmatprep.subr.bf16.mxu0 %v3261_v58 }
 0xe1f   :  { %3031 = vmatpush3.bf16.msra.mxu0 %v3262_v63 }
 0xe20   :  { %3032 = vmatprep.subr.bf16.mxu0 %v3263_v37 }
 0xe23   :  { %3033 = vmatpush3.bf16.msra.mxu0 %v3264_v50 }
 0xee3   :  { %v2545_v38 = vpop.f32.mrb[36].mxu1 }
 0xee4   :  { %v2547_v29 = vpop.f32.mrb[37].mxu1  ;;  %v2546_v0 = vadd.f32 %v2545_v38, %v2463_v10 }
 0xee5   :  { %v2548_v1 = vadd.f32 %v2547_v29, %v2467_v62  ;;  %v2549_v61 = vpop.f32.mrb[38].mxu1  ;;  %v2579_v29 = vrot.slane %v4178_v23, %v4025_v13 }
 0xee6   :  { %v2551_v4 = vpop.f32.mrb[39].mxu1  ;;  %v2550_v53 = vadd.f32 %v2549_v61, %v2463_v10 }
 0xee7   :  { %v2552_v28 = vadd.f32 %v2551_v4, %v2467_v62  ;;  %2590 = vadd.xlane.f32.xlu0 %v2548_v1 }
 0xee9   :  { %2592 = vadd.xlane.f32.xlu1 %v2552_v28 }
 0xeeb   :  { %2554 = vadd.xlane.f32.xlu0 %v2546_v0 }
 0xeed   :  { %2556 = vadd.xlane.f32.xlu1 %v2550_v53 }
 0xf74   :  { %v2591_v35 = vpop.xlane.xlu0 %2590 }
 0xf75   :  { %v2594_v19 = vmul.f32 0.0078125, %v2591_v35 }
 0xf76   :  { %v2593_v41 = vpop.xlane.xlu1 %2592 }
 0xf77   :  { %v4215_v7 = vsub.f32 %v2548_v1, %v2594_v19  ;;  %v2595_v8 = vmul.f32 0.0078125, %v2593_v41 }
 0xf78   :  { %v2555_v59 = vpop.xlane.xlu0 %2554 }
 0xf79   :  { %v4217_v44 = vsub.f32 %v2552_v28, %v2595_v8  ;;  %v2558_v22 = vmul.f32 0.0078125, %v2555_v59  ;;  %v2598_v33 = vmul.f32 %v4215_v7, %v4215_v7  ;;  %v2585_v28 = vrot.slane %v4178_v23, %v4142_v32 }
 0xf7a   :  { %v2557_v55 = vpop.xlane.xlu1 %2556 }
 0xf7b   :  { %v4221_v20 = vsub.f32 %v2546_v0, %v2558_v22  ;;  %v2559_v36 = vmul.f32 0.0078125, %v2557_v55  ;;  %2600 = vadd.xlane.f32.xlu0 %v2598_v33  ;;  %v2599_v9 = vmul.f32 %v4217_v44, %v4217_v44 }
 0xf7d   :  { %v4225_v26 = vsub.f32 %v2550_v53, %v2559_v36  ;;  %2602 = vadd.xlane.f32.xlu1 %v2599_v9  ;;  %v2562_v27 = vmul.f32 %v4221_v20, %v4221_v20 }
 0xf7f   :  { %2564 = vadd.xlane.f32.xlu0 %v2562_v27  ;;  %v2563_v47 = vmul.f32 %v4225_v26, %v4225_v26 }
 0xf81   :  { %2566 = vadd.xlane.f32.xlu1 %v2563_v47 }
0x1008   :  { %v2601_v54 = vpop.xlane.xlu0 %2600 }
0x1009   :  { %v2604_v2 = vmul.f32 0.0078125, %v2601_v54 }
0x100a   :  { %v2603_v48 = vpop.xlane.xlu1 %2602 }
0x100b   :  { %v2606_v21 = vadd.f32 1e-05, %v2604_v2  ;;  %v2605_v15 = vmul.f32 0.0078125, %v2603_v48 }
0x100c   :  { %v2565_v30 = vpop.xlane.xlu0 %2564 }
0x100d   :  { %3343 = vrsqrt.f32 %v2606_v21  ;;  %v2607_v34 = vadd.f32 1e-05, %v2605_v15  ;;  %v2568_v42 = vmul.f32 0.0078125, %v2565_v30 }
0x100e   :  { %v2567_v12 = vpop.xlane.xlu1 %2566 }
0x100f   :  { %3345 = vrsqrt.f32 %v2607_v34  ;;  %v2570_v5 = vadd.f32 1e-05, %v2568_v42  ;;  %v2569_v57 = vmul.f32 0.0078125, %v2567_v12 }
0x1011   :  { %3347 = vrsqrt.f32 %v2570_v5  ;;  %v2571_v24 = vadd.f32 1e-05, %v2569_v57 }
0x1013   :  { %3349 = vrsqrt.f32 %v2571_v24 }
0x1017   :  { %v3344_v46 = vpop.eup %3343 }
0x1018   :  { %v2610_v40 = vmul.f32 %v3344_v46, %v4215_v7 }
0x1019   :  { %v3346_v49 = vpop.eup %3345 }
0x101a   :  { %v2611_v62 = vmul.f32 %v3346_v49, %v4217_v44  ;;  %v2616_v38 = vmul.f32 %v2615_v43, %v2610_v40 }
0x101b   :  { %v3348_v10 = vpop.eup %3347 }
0x101c   :  { %v2574_v1 = vmul.f32 %v3348_v10, %v4221_v20  ;;  %v2617_v61 = vmul.f32 %v2615_v43, %v2611_v62  ;;  %v2622_v4 = vadd.f32 %v2621_v39, %v2616_v38 }
0x101d   :  { %v3350_v0 = vpop.eup %3349 }
0x101e   :  { %v2575_v53 = vmul.f32 %v3350_v0, %v4225_v26  ;;  %v2623_v17 = vadd.f32 %v2621_v39, %v2617_v61  ;;  %v2580_v16 = vmul.f32 %v2579_v29, %v2574_v1  ;;  %v2624_v35 = vmax.f32 %v2622_v4, 0.0 }
0x1020   :  { %v2625_v19 = vmax.f32 %v2623_v17, 0.0  ;;  %v2581_v41 = vmul.f32 %v2579_v29, %v2575_v53  ;;  %v2586_v7 = vadd.f32 %v2585_v28, %v2580_v16 }
0x1022   :  { %v2627_v8 = vpack.c.bf16 %v2625_v19, %v2624_v35  ;;  %v2587_v59 = vadd.f32 %v2585_v28, %v2581_v41  ;;  %v2588_v13 = vmax.f32 %v2586_v7, 0.0 }
0x1024   :  { %2792 = vmatprep.mubr.bf16.mxu0 %v2627_v8  ;;  %v2589_v44 = vmax.f32 %v2587_v59, 0.0 }
0x1026   :  { %v2626_v22 = vpack.c.bf16 %v2589_v44, %v2588_v13 }
0x1028   :  { %2793 = vmatmul.mubr.bf16.vlgmr.msra.gmra.mrb[20].mxu0 %v2626_v22 }
0x1029   :  { %3386 = shalt.err (!%p3383_p12)
}
0x102a   :  { %s3387_s17 = scalar_lea.hbm %s4276_s4, 64 }
0x102b   :  { %p3388_p13 = scmp.ne.s32.totalorder %s4276_s4, %s3387_s17  ;;  %p3391_p0 = scmp.lt.u32.totalorder %s3387_s17, %s4276_s4 }
0x102d   :  { %p3393_p1 = pnand %p3391_p0, %p3388_p13 }
0x102f   :  { %3396 = shalt.err (!%p3393_p1)
}
0x1030   :  { %2812 = dma.vmem_to_hbm [thread:$0]  %s2810_s13, 64, %s4276_s4, [#allocation4]   ;;  %v2663_v33 = vrot.slane %v4178_v23, %v4168_v14 }
0x1031   :  { %s3434_s0 = smov [#allocation6]  }
0x1032   :  { %s2818_s24 = sshll.u32 %s3434_s0, 4  ;;  %s2819_s24 = int_to_ptr.vmem [resolvable:$true] %s2818_s24 }
0x1033   :  { %s3397_s25 = scalar_lea.vmem %s2819_s24, 256  ;;  %p3402_p3 = scmp.lt.s32.totalorder %s2819_s24, %s2819_s24 }
0x1034   :  { %p3398_p2 = scmp.ne.s32.totalorder %s2819_s24, %s3397_s25  ;;  %p3403_p4 = scmp.lt.s32.totalorder %s3397_s25, %s3397_s25 }
0x1036   :  { %p3404_p5 = por %p3403_p4, %p3402_p3 }
0x1038   :  { %p3405_p6 = pnand %p3404_p5, %p3398_p2 }
0x10fb   :  { %v3034_v32 = vpop.f32.mrb[20].mxu0 }
0x10fc   :  { %v3035_v55 = vpop.f32.mrb[21].mxu0 }
0x10fd   :  { %v3036_v20 = vadd.f32 %v3035_v55, %v3034_v32  ;;  %v3037_v36 = vpop.f32.mrb[22].mxu0 }
0x10fe   :  { %v3038_v9 = vpop.f32.mrb[23].mxu0 }
0x10ff   :  { %v2795_v26 = vadd.f32 %v3036_v20, %v2663_v33  ;;  %v3039_v27 = vadd.f32 %v3038_v9, %v3037_v36 }
0x1101   :  { %2801 = vst [vmem:[#allocation6] sm:$0xff] %v2795_v26  ;;  %v2798_v47 = vadd.f32 %v3039_v27, %v2663_v33 }
0x1103   :  { %2802 = vst [vmem:[#allocation6 + $0x8] sm:$0xff] %v2798_v47 }
0x1104   :  { %3408 = shalt.err (!%p3405_p6)
}
0x1105   :  { %s3409_s27 = scalar_lea.hbm %s4277_s5, 256 }
0x1106   :  { %p3410_p7 = scmp.ne.s32.totalorder %s4277_s5, %s3409_s27  ;;  %p3413_p8 = scmp.lt.u32.totalorder %s3409_s27, %s4277_s5 }
0x1108   :  { %p3415_p9 = pnand %p3413_p8, %p3410_p7 }
0x110a   :  { %3418 = shalt.err (!%p3415_p9)
}
0x110b   :  { %2824 = dma.vmem_to_hbm [thread:$0]  %s2819_s24, 256, %s4277_s5, [#allocation7], %s3426_s28, %s3426_s28, %s3427_s29  }
0x110c   :  { %3421 = dma.done.wait [#allocation4], 64  }
0x110d   :  { %3422 = vsyncadd [#allocation4], 4294967232 }
0x110e   :  { %3423 = dma.done.wait [#allocation7], 256  }
0x110f   :  { %3424 = vsyncadd [#allocation7], 4294967040 }
0x1110   :  { %2831 = vsyncpa [#allocation3], 1 }
0x1111   :  { %2832 = vsyncpa [#allocation4], 1 }
0x1112   :  { %2833 = vsyncpa [#allocation7], 1 }

</bundles_post_ra>
